<compile_context>
chip_gen: v7x
topology: tpu7x:2x2x1
jax: 0.10.0
libtpu: 0.0.40
codegen_flags: <defaults>
</compile_context>

<pallas_src>
import math

import jax
import jax.numpy as jnp
from jax import lax
from jax.experimental import pallas as pl
from jax.experimental.pallas import tpu as pltpu

# ----------------------------- config (small, synthetic) -----------------------------
BATCH = 2
SEQ = 8
HIDDEN = 32
NUM_HEADS = 4
HEAD_DIM = HIDDEN // NUM_HEADS
INTERMEDIATE = 64
NUM_LAYERS = 12
NUM_CLASSES = 8
VOCAB = 50
MAX_POS = 64
LN_EPS = 1e-12
BS = BATCH * SEQ
HB = NUM_HEADS * BATCH           # head-major attention batch


def _layernorm(x, g, b):
    mu = jnp.mean(x, axis=-1, keepdims=True)
    var = jnp.mean((x - mu) * (x - mu), axis=-1, keepdims=True)
    return (x - mu) * lax.rsqrt(var + LN_EPS) * g + b


# ----------------------------- fused Pallas kernel -----------------------------
def fused_bert_kernel(
    emb_ref, emb_g_ref, emb_b_ref, bias_ref,
    qkv_w_ref, qkv_b_ref, ao_w_ref, ao_b_ref,
    ln1_g_ref, ln1_b_ref, i_w_ref, i_b_ref,
    o_w_ref, o_b_ref, ln2_g_ref, ln2_b_ref,
    fc_w_ref, fc_b_ref,
    out_ref,
):
    scale = 1.0 / math.sqrt(HEAD_DIM)
    # mask bias, already broadcast (once, in the wrapper) to the head-major
    # score layout [NUM_HEADS*BATCH, SEQ, SEQ]; loaded once, reused by all layers.
    bias = bias_ref[...]

    def split_heads(qkv2d, base):
        # [B*S, 3H] lane-slices -> [NUM_HEADS*BATCH, SEQ, HEAD_DIM] (head-major batch)
        pieces = [qkv2d[:, base + h * HEAD_DIM: base + (h + 1) * HEAD_DIM]
                  for h in range(NUM_HEADS)]
        return jnp.stack(pieces, axis=0).reshape(HB, SEQ, HEAD_DIM)

    def merge_heads(x3d):
        # [NUM_HEADS*BATCH, SEQ, HEAD_DIM] -> [B*S, HIDDEN] (heads contiguous in lanes)
        x_h = x3d.reshape(NUM_HEADS, BS, HEAD_DIM)
        return jnp.concatenate([x_h[h] for h in range(NUM_HEADS)], axis=-1)

    def encoder_layer(l, h_in):
        # ---- fused QKV projection: one [B*S, H] x [H, 3H] matmul ----
        qkv = (jnp.dot(h_in, qkv_w_ref[l], preferred_element_type=jnp.float32)
               + qkv_b_ref[l])                                        # [B*S, 3H]
        q = split_heads(qkv, 0)
        k = split_heads(qkv, HIDDEN)
        v = split_heads(qkv, 2 * HIDDEN)

        # ---- all heads batched: 2 contractions + 1 softmax per layer ----
        s = jnp.einsum("bqd,bkd->bqk", q, k,
                       preferred_element_type=jnp.float32) * scale + bias
        s = s - jnp.max(s, axis=-1, keepdims=True)
        p = jnp.exp(s)
        p = p / jnp.sum(p, axis=-1, keepdims=True)       # exact divide (ref parity)
        ctx = merge_heads(
            jnp.einsum("bqk,bkd->bqd", p, v, preferred_element_type=jnp.float32))

        # ---- attention output proj + residual + LN ----
        attn = (jnp.dot(ctx, ao_w_ref[l], preferred_element_type=jnp.float32)
                + ao_b_ref[l])
        h1 = _layernorm(attn + h_in, ln1_g_ref[l], ln1_b_ref[l])

        # ---- FFN (gelu) + residual + LN ----
        inter = (jnp.dot(h1, i_w_ref[l], preferred_element_type=jnp.float32)
                 + i_b_ref[l])
        # TODO(synk): HF BERT uses erf-based gelu; tanh approximation used here.
        inter = 0.5 * inter * (1.0 + jnp.tanh(
            0.7978845608028654 * (inter + 0.044715 * inter * inter * inter)))
        ffn = (jnp.dot(inter, o_w_ref[l], preferred_element_type=jnp.float32)
               + o_b_ref[l])
        return _layernorm(ffn + h1, ln2_g_ref[l], ln2_b_ref[l])

    # ---- embedding LayerNorm (dropout = identity in eval) ----
    h0 = _layernorm(emb_ref[...], emb_g_ref[...], emb_b_ref[...])

    # ---- layers 0 .. L-5: pooled states not needed -> skip pool reduction ----
    h_mid = lax.fori_loop(0, NUM_LAYERS - 4, encoder_layer, h0)

    # ---- layers L-4 .. L-1: running seq-max pool == max over hidden_states[9..12] ----
    def tail_layer(l, carry):
        h, pool = carry
        h2 = encoder_layer(l, h)
        m = jnp.max(h2.reshape(BATCH, SEQ, HIDDEN), axis=1)           # [B, H]
        return h2, jnp.maximum(pool, m)

    pool0 = jnp.full((BATCH, HIDDEN), -jnp.inf, jnp.float32)
    _, pool = lax.fori_loop(NUM_LAYERS - 4, NUM_LAYERS, tail_layer, (h_mid, pool0))

    # ---- classifier Linear (dropout = identity); single (2,8) store per kernel ----
    out_ref[...] = (jnp.dot(pool, fc_w_ref[...], preferred_element_type=jnp.float32)
                    + fc_b_ref[...]).astype(out_ref.dtype)


# ----------------------------- wrapper -----------------------------
def _const_spec(shape):
    zeros = (0,) * len(shape)
    return pl.BlockSpec(shape, lambda i, _z=zeros: _z)


def fused_forward(emb2d, bias_hb, stk, emb_ln_g, emb_ln_b, fc_w, fc_b):
    return pl.pallas_call(
        fused_bert_kernel,
        out_shape=jax.ShapeDtypeStruct((BATCH, NUM_CLASSES), jnp.float32),
        grid=(1,),
        in_specs=[
            _const_spec((BS, HIDDEN)),                        # emb (word+pos+type)
            _const_spec((1, HIDDEN)),                         # emb LN gamma
            _const_spec((1, HIDDEN)),                         # emb LN beta
            _const_spec((HB, SEQ, SEQ)),                      # attn-mask bias (head-major)
            _const_spec((NUM_LAYERS, HIDDEN, 3 * HIDDEN)),    # qkv_w
            _const_spec((NUM_LAYERS, 1, 3 * HIDDEN)),         # qkv_b
            _const_spec((NUM_LAYERS, HIDDEN, HIDDEN)),        # ao_w
            _const_spec((NUM_LAYERS, 1, HIDDEN)),             # ao_b
            _const_spec((NUM_LAYERS, 1, HIDDEN)),             # ln1_g
            _const_spec((NUM_LAYERS, 1, HIDDEN)),             # ln1_b
            _const_spec((NUM_LAYERS, HIDDEN, INTERMEDIATE)),  # i_w
            _const_spec((NUM_LAYERS, 1, INTERMEDIATE)),       # i_b
            _const_spec((NUM_LAYERS, INTERMEDIATE, HIDDEN)),  # o_w
            _const_spec((NUM_LAYERS, 1, HIDDEN)),             # o_b
            _const_spec((NUM_LAYERS, 1, HIDDEN)),             # ln2_g
            _const_spec((NUM_LAYERS, 1, HIDDEN)),             # ln2_b
            _const_spec((HIDDEN, NUM_CLASSES)),               # fc_w
            _const_spec((1, NUM_CLASSES)),                    # fc_b
        ],
        out_specs=pl.BlockSpec((BATCH, NUM_CLASSES), lambda i: (0, 0)),
        compiler_params=pltpu.CompilerParams(
            dimension_semantics=("arbitrary",),
        ),
    )(
        emb2d, emb_ln_g, emb_ln_b, bias_hb,
        stk["qkv_w"], stk["qkv_b"], stk["ao_w"], stk["ao_b"],
        stk["ln1_g"], stk["ln1_b"], stk["i_w"], stk["i_b"],
        stk["o_w"], stk["o_b"], stk["ln2_g"], stk["ln2_b"],
        fc_w, fc_b,
    )


@jax.jit
def forward(params, context, mask):
    B, S = context.shape
    # embeddings (gathers stay in XLA)
    emb = (
        params["word_emb"][context]
        + params["pos_emb"][jnp.arange(S)][None]
        + params["type_emb"][0][None, None]
    )                                                               # [B, S, H]
    # HF-style extended attention mask bias, pre-broadcast ONCE to the
    # head-major score layout used inside the kernel: [NH*B, S(q), S(k)].
    ext = (1.0 - mask.astype(jnp.float32)) * -10000.0               # [B, S]
    bias_hb = jnp.broadcast_to(
        ext[None, :, None, :], (NUM_HEADS, B, S, S)
    ).reshape(NUM_HEADS * B, S, S)
    return fused_forward(
        emb.reshape(B * S, HIDDEN), bias_hb, params["layers"],
        params["emb_ln_g"], params["emb_ln_b"],
        params["fc_w"], params["fc_b"],
    )


# ----------------------------- deterministic parameter init -----------------------------
def init_params(key):
    keys = iter(jax.random.split(key, 4 + NUM_LAYERS * 6))

    def nrm(shape):
        return jax.random.normal(next(keys), shape, jnp.float32) * 0.02

    layers = []
    for _ in range(NUM_LAYERS):
        layers.append(dict(
            q_w=nrm((HIDDEN, HIDDEN)), q_b=jnp.zeros((HIDDEN,), jnp.float32),
            k_w=nrm((HIDDEN, HIDDEN)), k_b=jnp.zeros((HIDDEN,), jnp.float32),
            v_w=nrm((HIDDEN, HIDDEN)), v_b=jnp.zeros((HIDDEN,), jnp.float32),
            ao_w=nrm((HIDDEN, HIDDEN)), ao_b=jnp.zeros((HIDDEN,), jnp.float32),
            ln1_g=jnp.ones((HIDDEN,), jnp.float32), ln1_b=jnp.zeros((HIDDEN,), jnp.float32),
            i_w=nrm((HIDDEN, INTERMEDIATE)), i_b=jnp.zeros((INTERMEDIATE,), jnp.float32),
            o_w=nrm((INTERMEDIATE, HIDDEN)), o_b=jnp.zeros((HIDDEN,), jnp.float32),
            ln2_g=jnp.ones((HIDDEN,), jnp.float32), ln2_b=jnp.zeros((HIDDEN,), jnp.float32),
        ))

    # stack per-layer weights along a leading L axis; fuse Q|K|V into [H, 3H]
    stk = {
        "qkv_w": jnp.stack([jnp.concatenate([lp["q_w"], lp["k_w"], lp["v_w"]], axis=1)
                            for lp in layers]),
        "qkv_b": jnp.stack([jnp.concatenate([lp["q_b"], lp["k_b"], lp["v_b"]])[None, :]
                            for lp in layers]),
        "ao_w": jnp.stack([lp["ao_w"] for lp in layers]),
        "ao_b": jnp.stack([lp["ao_b"][None, :] for lp in layers]),
        "ln1_g": jnp.stack([lp["ln1_g"][None, :] for lp in layers]),
        "ln1_b": jnp.stack([lp["ln1_b"][None, :] for lp in layers]),
        "i_w": jnp.stack([lp["i_w"] for lp in layers]),
        "i_b": jnp.stack([lp["i_b"][None, :] for lp in layers]),
        "o_w": jnp.stack([lp["o_w"] for lp in layers]),
        "o_b": jnp.stack([lp["o_b"][None, :] for lp in layers]),
        "ln2_g": jnp.stack([lp["ln2_g"][None, :] for lp in layers]),
        "ln2_b": jnp.stack([lp["ln2_b"][None, :] for lp in layers]),
    }

    return {
        "word_emb": nrm((VOCAB, HIDDEN)),
        "pos_emb": nrm((MAX_POS, HIDDEN)),
        "type_emb": nrm((2, HIDDEN)),
        "emb_ln_g": jnp.ones((1, HIDDEN), jnp.float32),
        "emb_ln_b": jnp.zeros((1, HIDDEN), jnp.float32),
        "fc_w": nrm((HIDDEN, NUM_CLASSES)),
        "fc_b": jnp.zeros((1, NUM_CLASSES), jnp.float32),
        "layers": stk,
    }


# ----------------------------- main -----------------------------
if __name__ == "__main__":
    key = jax.random.PRNGKey(0)
    pkey, dkey = jax.random.split(key)
    params = init_params(pkey)

    context = jax.random.randint(dkey, (BATCH, SEQ), 0, VOCAB, dtype=jnp.int32)
    seq_len = jnp.full((BATCH,), SEQ, jnp.int32)          # placeholder (x[1], unused)
    mask = jnp.array([[1] * SEQ, [1] * (SEQ - 2) + [0] * 2], dtype=jnp.int32)
    x = (context, seq_len, mask)

    out = forward(params, x[0], x[2])                      # mirrors Model.forward(x)
    jax.block_until_ready(out)
    assert out.shape == (BATCH, NUM_CLASSES)
    print("KERNEL_OK")
</pallas_src>

<mosaic_0001>
module attributes {stable_mosaic.version = 11 : i64} {
  func.func @fused_bert_kernel(%arg0: i32, %arg1: memref<16x32xf32, #tpu.memory_space<vmem>>, %arg2: memref<1x32xf32, #tpu.memory_space<vmem>>, %arg3: memref<1x32xf32, #tpu.memory_space<vmem>>, %arg4: memref<8x8x8xf32, #tpu.memory_space<vmem>>, %arg5: memref<12x32x96xf32, #tpu.memory_space<vmem>>, %arg6: memref<12x1x96xf32, #tpu.memory_space<vmem>>, %arg7: memref<12x32x32xf32, #tpu.memory_space<vmem>>, %arg8: memref<12x1x32xf32, #tpu.memory_space<vmem>>, %arg9: memref<12x1x32xf32, #tpu.memory_space<vmem>>, %arg10: memref<12x1x32xf32, #tpu.memory_space<vmem>>, %arg11: memref<12x32x64xf32, #tpu.memory_space<vmem>>, %arg12: memref<12x1x64xf32, #tpu.memory_space<vmem>>, %arg13: memref<12x64x32xf32, #tpu.memory_space<vmem>>, %arg14: memref<12x1x32xf32, #tpu.memory_space<vmem>>, %arg15: memref<12x1x32xf32, #tpu.memory_space<vmem>>, %arg16: memref<12x1x32xf32, #tpu.memory_space<vmem>>, %arg17: memref<32x8xf32, #tpu.memory_space<vmem>>, %arg18: memref<1x8xf32, #tpu.memory_space<vmem>>, %arg19: memref<2x8xf32, #tpu.memory_space<vmem>>) attributes {dimension_semantics = [#tpu.dimension_semantics<arbitrary>], iteration_bounds = array<i64: 1>, scalar_prefetch = 0 : i64, scratch_operands = 0 : i64, tpu.core_type = #tpu.core_type<tc>, window_params = [{pipeline_mode = #tpu.pipeline_mode<synchronous>, transform_indices = @transform_0, window_bounds = array<i64: 16, 32>}, {pipeline_mode = #tpu.pipeline_mode<synchronous>, transform_indices = @transform_1, window_bounds = array<i64: 1, 32>}, {pipeline_mode = #tpu.pipeline_mode<synchronous>, transform_indices = @transform_2, window_bounds = array<i64: 1, 32>}, {pipeline_mode = #tpu.pipeline_mode<synchronous>, transform_indices = @transform_3, window_bounds = array<i64: 8, 8, 8>}, {pipeline_mode = #tpu.pipeline_mode<synchronous>, transform_indices = @transform_4, window_bounds = array<i64: 12, 32, 96>}, {pipeline_mode = #tpu.pipeline_mode<synchronous>, transform_indices = @transform_5, window_bounds = array<i64: 12, 1, 96>}, {pipeline_mode = #tpu.pipeline_mode<synchronous>, transform_indices = @transform_6, window_bounds = array<i64: 12, 32, 32>}, {pipeline_mode = #tpu.pipeline_mode<synchronous>, transform_indices = @transform_7, window_bounds = array<i64: 12, 1, 32>}, {pipeline_mode = #tpu.pipeline_mode<synchronous>, transform_indices = @transform_8, window_bounds = array<i64: 12, 1, 32>}, {pipeline_mode = #tpu.pipeline_mode<synchronous>, transform_indices = @transform_9, window_bounds = array<i64: 12, 1, 32>}, {pipeline_mode = #tpu.pipeline_mode<synchronous>, transform_indices = @transform_10, window_bounds = array<i64: 12, 32, 64>}, {pipeline_mode = #tpu.pipeline_mode<synchronous>, transform_indices = @transform_11, window_bounds = array<i64: 12, 1, 64>}, {pipeline_mode = #tpu.pipeline_mode<synchronous>, transform_indices = @transform_12, window_bounds = array<i64: 12, 64, 32>}, {pipeline_mode = #tpu.pipeline_mode<synchronous>, transform_indices = @transform_13, window_bounds = array<i64: 12, 1, 32>}, {pipeline_mode = #tpu.pipeline_mode<synchronous>, transform_indices = @transform_14, window_bounds = array<i64: 12, 1, 32>}, {pipeline_mode = #tpu.pipeline_mode<synchronous>, transform_indices = @transform_15, window_bounds = array<i64: 12, 1, 32>}, {pipeline_mode = #tpu.pipeline_mode<synchronous>, transform_indices = @transform_16, window_bounds = array<i64: 32, 8>}, {pipeline_mode = #tpu.pipeline_mode<synchronous>, transform_indices = @transform_17, window_bounds = array<i64: 1, 8>}, {pipeline_mode = #tpu.pipeline_mode<synchronous>, transform_indices = @transform_18, window_bounds = array<i64: 2, 8>}]} {
    %c0 = arith.constant 0 : index
    %c0_0 = arith.constant 0 : index
    %c0_1 = arith.constant 0 : index
    %0 = vector.load %arg4[%c0, %c0_0, %c0_1] : memref<8x8x8xf32, #tpu.memory_space<vmem>>, vector<8x8x8xf32>
    %c0_2 = arith.constant 0 : index
    %c0_3 = arith.constant 0 : index
    %1 = vector.load %arg1[%c0_2, %c0_3] : memref<16x32xf32, #tpu.memory_space<vmem>>, vector<16x32xf32>
    %c0_4 = arith.constant 0 : index
    %c0_5 = arith.constant 0 : index
    %2 = vector.load %arg2[%c0_4, %c0_5] : memref<1x32xf32, #tpu.memory_space<vmem>>, vector<1x32xf32>
    %c0_6 = arith.constant 0 : index
    %c0_7 = arith.constant 0 : index
    %3 = vector.load %arg3[%c0_6, %c0_7] : memref<1x32xf32, #tpu.memory_space<vmem>>, vector<1x32xf32>
    %cst = arith.constant dense<0.000000e+00> : vector<16xf32>
    %4 = vector.multi_reduction <add>, %1, %cst [1] : vector<16x32xf32> to vector<16xf32>
    %5 = vector.shape_cast %4 : vector<16xf32> to vector<16x1xf32>
    %cst_8 = arith.constant 3.200000e+01 : f32
    %6 = vector.broadcast %cst_8 : f32 to vector<16x1xf32>
    %7 = arith.divf %5, %6 : vector<16x1xf32>
    %8 = vector.broadcast %7 : vector<16x1xf32> to vector<16x32xf32>
    %9 = arith.subf %1, %8 : vector<16x32xf32>
    %10 = vector.broadcast %7 : vector<16x1xf32> to vector<16x32xf32>
    %11 = arith.subf %1, %10 : vector<16x32xf32>
    %12 = arith.mulf %9, %11 : vector<16x32xf32>
    %cst_9 = arith.constant dense<0.000000e+00> : vector<16xf32>
    %13 = vector.multi_reduction <add>, %12, %cst_9 [1] : vector<16x32xf32> to vector<16xf32>
    %14 = vector.shape_cast %13 : vector<16xf32> to vector<16x1xf32>
    %cst_10 = arith.constant 3.200000e+01 : f32
    %15 = vector.broadcast %cst_10 : f32 to vector<16x1xf32>
    %16 = arith.divf %14, %15 : vector<16x1xf32>
    %17 = vector.broadcast %7 : vector<16x1xf32> to vector<16x32xf32>
    %18 = arith.subf %1, %17 : vector<16x32xf32>
    %cst_11 = arith.constant 9.99999996E-13 : f32
    %19 = vector.broadcast %cst_11 : f32 to vector<16x1xf32>
    %20 = arith.addf %16, %19 : vector<16x1xf32>
    %21 = math.rsqrt %20 : vector<16x1xf32>
    %22 = vector.broadcast %21 : vector<16x1xf32> to vector<16x32xf32>
    %23 = arith.mulf %18, %22 : vector<16x32xf32>
    %24 = vector.broadcast %2 : vector<1x32xf32> to vector<16x32xf32>
    %25 = arith.mulf %23, %24 : vector<16x32xf32>
    %26 = vector.broadcast %3 : vector<1x32xf32> to vector<16x32xf32>
    %27 = arith.addf %25, %26 : vector<16x32xf32>
    %c0_i32 = arith.constant 0 : i32
    %c8_i32 = arith.constant 8 : i32
    %28 = arith.addi %c0_i32, %c8_i32 : i32
    %c1_i32 = arith.constant 1 : i32
    %29 = scf.for %arg20 = %c0_i32 to %28 step %c1_i32 iter_args(%arg21 = %27) -> (vector<16x32xf32>)  : i32 {
      %39 = arith.index_cast %arg20 : i32 to index
      %c0_24 = arith.constant 0 : index
      %c0_25 = arith.constant 0 : index
      %40 = vector.load %arg5[%39, %c0_24, %c0_25] : memref<12x32x96xf32, #tpu.memory_space<vmem>>, vector<1x32x96xf32>
      %41 = vector.shape_cast %40 : vector<1x32x96xf32> to vector<32x96xf32>
      %cst_26 = arith.constant dense<0.000000e+00> : vector<16x96xf32>
      %42 = tpu.matmul %arg21, %41, %cst_26 {dimension_numbers = #tpu.dot_dimension_numbers<[1], [0], [0], [1], [0, 0, 1, 1], [], []>} : vector<16x32xf32>, vector<32x96xf32>, vector<16x96xf32> -> vector<16x96xf32>
      %43 = arith.index_cast %arg20 : i32 to index
      %c0_27 = arith.constant 0 : index
      %c0_28 = arith.constant 0 : index
      %44 = vector.load %arg6[%43, %c0_27, %c0_28] : memref<12x1x96xf32, #tpu.memory_space<vmem>>, vector<1x1x96xf32>
      %45 = vector.shape_cast %44 : vector<1x1x96xf32> to vector<1x96xf32>
      %46 = vector.broadcast %45 : vector<1x96xf32> to vector<16x96xf32>
      %47 = arith.addf %42, %46 : vector<16x96xf32>
      %48 = vector.extract_strided_slice %47 {offsets = [0, 0], sizes = [16, 8], strides = [1, 1]} : vector<16x96xf32> to vector<16x8xf32>
      %49 = vector.extract_strided_slice %47 {offsets = [0, 8], sizes = [16, 8], strides = [1, 1]} : vector<16x96xf32> to vector<16x8xf32>
      %50 = vector.extract_strided_slice %47 {offsets = [0, 16], sizes = [16, 8], strides = [1, 1]} : vector<16x96xf32> to vector<16x8xf32>
      %51 = vector.extract_strided_slice %47 {offsets = [0, 24], sizes = [16, 8], strides = [1, 1]} : vector<16x96xf32> to vector<16x8xf32>
      %52 = vector.shape_cast %48 : vector<16x8xf32> to vector<1x16x8xf32>
      %53 = vector.shape_cast %49 : vector<16x8xf32> to vector<1x16x8xf32>
      %54 = vector.shape_cast %50 : vector<16x8xf32> to vector<1x16x8xf32>
      %55 = vector.shape_cast %51 : vector<16x8xf32> to vector<1x16x8xf32>
      %56 = tpu.concatenate %52, %53, %54, %55 in 0 : vector<1x16x8xf32>, vector<1x16x8xf32>, vector<1x16x8xf32>, vector<1x16x8xf32> -> vector<4x16x8xf32>
      %57 = vector.shape_cast %56 : vector<4x16x8xf32> to vector<8x8x8xf32>
      %58 = vector.extract_strided_slice %47 {offsets = [0, 32], sizes = [16, 8], strides = [1, 1]} : vector<16x96xf32> to vector<16x8xf32>
      %59 = vector.extract_strided_slice %47 {offsets = [0, 40], sizes = [16, 8], strides = [1, 1]} : vector<16x96xf32> to vector<16x8xf32>
      %60 = vector.extract_strided_slice %47 {offsets = [0, 48], sizes = [16, 8], strides = [1, 1]} : vector<16x96xf32> to vector<16x8xf32>
      %61 = vector.extract_strided_slice %47 {offsets = [0, 56], sizes = [16, 8], strides = [1, 1]} : vector<16x96xf32> to vector<16x8xf32>
      %62 = vector.shape_cast %58 : vector<16x8xf32> to vector<1x16x8xf32>
      %63 = vector.shape_cast %59 : vector<16x8xf32> to vector<1x16x8xf32>
      %64 = vector.shape_cast %60 : vector<16x8xf32> to vector<1x16x8xf32>
      %65 = vector.shape_cast %61 : vector<16x8xf32> to vector<1x16x8xf32>
      %66 = tpu.concatenate %62, %63, %64, %65 in 0 : vector<1x16x8xf32>, vector<1x16x8xf32>, vector<1x16x8xf32>, vector<1x16x8xf32> -> vector<4x16x8xf32>
      %67 = vector.shape_cast %66 : vector<4x16x8xf32> to vector<8x8x8xf32>
      %68 = vector.extract_strided_slice %47 {offsets = [0, 64], sizes = [16, 8], strides = [1, 1]} : vector<16x96xf32> to vector<16x8xf32>
      %69 = vector.extract_strided_slice %47 {offsets = [0, 72], sizes = [16, 8], strides = [1, 1]} : vector<16x96xf32> to vector<16x8xf32>
      %70 = vector.extract_strided_slice %47 {offsets = [0, 80], sizes = [16, 8], strides = [1, 1]} : vector<16x96xf32> to vector<16x8xf32>
      %71 = vector.extract_strided_slice %47 {offsets = [0, 88], sizes = [16, 8], strides = [1, 1]} : vector<16x96xf32> to vector<16x8xf32>
      %72 = vector.shape_cast %68 : vector<16x8xf32> to vector<1x16x8xf32>
      %73 = vector.shape_cast %69 : vector<16x8xf32> to vector<1x16x8xf32>
      %74 = vector.shape_cast %70 : vector<16x8xf32> to vector<1x16x8xf32>
      %75 = vector.shape_cast %71 : vector<16x8xf32> to vector<1x16x8xf32>
      %76 = tpu.concatenate %72, %73, %74, %75 in 0 : vector<1x16x8xf32>, vector<1x16x8xf32>, vector<1x16x8xf32>, vector<1x16x8xf32> -> vector<4x16x8xf32>
      %77 = vector.shape_cast %76 : vector<4x16x8xf32> to vector<8x8x8xf32>
      "tpu.trace_start"() <{level = 10 : i32, message = "bqd,bkd->bqk"}> : () -> ()
      %cst_29 = arith.constant dense<0.000000e+00> : vector<8x8x8xf32>
      %78 = tpu.matmul %57, %67, %cst_29 {dimension_numbers = #tpu.dot_dimension_numbers<[2], [2], [1], [1], [0, 0, 0, 1, 1, 1], [0], [0]>} : vector<8x8x8xf32>, vector<8x8x8xf32>, vector<8x8x8xf32> -> vector<8x8x8xf32>
      "tpu.trace_stop"() : () -> ()
      %cst_30 = arith.constant 0.353553385 : f32
      %79 = vector.broadcast %cst_30 : f32 to vector<8x8x8xf32>
      %80 = arith.mulf %78, %79 : vector<8x8x8xf32>
      %81 = arith.addf %80, %0 : vector<8x8x8xf32>
      %cst_31 = arith.constant dense<0xFF800000> : vector<8x8xf32>
      %82 = vector.multi_reduction <maximumf>, %81, %cst_31 [2] : vector<8x8x8xf32> to vector<8x8xf32>
      %83 = vector.shape_cast %82 : vector<8x8xf32> to vector<8x8x1xf32>
      %84 = vector.broadcast %83 : vector<8x8x1xf32> to vector<8x8x8xf32>
      %85 = arith.subf %81, %84 : vector<8x8x8xf32>
      %86 = math.exp %85 : vector<8x8x8xf32>
      %cst_32 = arith.constant dense<0.000000e+00> : vector<8x8xf32>
      %87 = vector.multi_reduction <add>, %86, %cst_32 [2] : vector<8x8x8xf32> to vector<8x8xf32>
      %88 = vector.shape_cast %87 : vector<8x8xf32> to vector<8x8x1xf32>
      %89 = vector.broadcast %88 : vector<8x8x1xf32> to vector<8x8x8xf32>
      %90 = arith.divf %86, %89 : vector<8x8x8xf32>
      "tpu.trace_start"() <{level = 10 : i32, message = "bqk,bkd->bqd"}> : () -> ()
      %cst_33 = arith.constant dense<0.000000e+00> : vector<8x8x8xf32>
      %91 = tpu.matmul %90, %77, %cst_33 {dimension_numbers = #tpu.dot_dimension_numbers<[2], [1], [1], [2], [0, 0, 0, 1, 1, 2], [0], [0]>} : vector<8x8x8xf32>, vector<8x8x8xf32>, vector<8x8x8xf32> -> vector<8x8x8xf32>
      "tpu.trace_stop"() : () -> ()
      %92 = vector.shape_cast %91 : vector<8x8x8xf32> to vector<4x16x8xf32>
      %93 = vector.extract_strided_slice %92 {offsets = [0, 0, 0], sizes = [1, 16, 8], strides = [1, 1, 1]} : vector<4x16x8xf32> to vector<1x16x8xf32>
      %94 = vector.shape_cast %93 : vector<1x16x8xf32> to vector<16x8xf32>
      %95 = vector.extract_strided_slice %92 {offsets = [1, 0, 0], sizes = [1, 16, 8], strides = [1, 1, 1]} : vector<4x16x8xf32> to vector<1x16x8xf32>
      %96 = vector.shape_cast %95 : vector<1x16x8xf32> to vector<16x8xf32>
      %97 = vector.extract_strided_slice %92 {offsets = [2, 0, 0], sizes = [1, 16, 8], strides = [1, 1, 1]} : vector<4x16x8xf32> to vector<1x16x8xf32>
      %98 = vector.shape_cast %97 : vector<1x16x8xf32> to vector<16x8xf32>
      %99 = vector.extract_strided_slice %92 {offsets = [3, 0, 0], sizes = [1, 16, 8], strides = [1, 1, 1]} : vector<4x16x8xf32> to vector<1x16x8xf32>
      %100 = vector.shape_cast %99 : vector<1x16x8xf32> to vector<16x8xf32>
      %101 = tpu.concatenate %94, %96, %98, %100 in 1 : vector<16x8xf32>, vector<16x8xf32>, vector<16x8xf32>, vector<16x8xf32> -> vector<16x32xf32>
      %102 = arith.index_cast %arg20 : i32 to index
      %c0_34 = arith.constant 0 : index
      %c0_35 = arith.constant 0 : index
      %103 = vector.load %arg7[%102, %c0_34, %c0_35] : memref<12x32x32xf32, #tpu.memory_space<vmem>>, vector<1x32x32xf32>
      %104 = vector.shape_cast %103 : vector<1x32x32xf32> to vector<32x32xf32>
      %cst_36 = arith.constant dense<0.000000e+00> : vector<16x32xf32>
      %105 = tpu.matmul %101, %104, %cst_36 {dimension_numbers = #tpu.dot_dimension_numbers<[1], [0], [0], [1], [0, 0, 1, 1], [], []>} : vector<16x32xf32>, vector<32x32xf32>, vector<16x32xf32> -> vector<16x32xf32>
      %106 = arith.index_cast %arg20 : i32 to index
      %c0_37 = arith.constant 0 : index
      %c0_38 = arith.constant 0 : index
      %107 = vector.load %arg8[%106, %c0_37, %c0_38] : memref<12x1x32xf32, #tpu.memory_space<vmem>>, vector<1x1x32xf32>
      %108 = vector.shape_cast %107 : vector<1x1x32xf32> to vector<1x32xf32>
      %109 = vector.broadcast %108 : vector<1x32xf32> to vector<16x32xf32>
      %110 = arith.addf %105, %109 : vector<16x32xf32>
      %111 = arith.addf %110, %arg21 : vector<16x32xf32>
      %112 = arith.index_cast %arg20 : i32 to index
      %c0_39 = arith.constant 0 : index
      %c0_40 = arith.constant 0 : index
      %113 = vector.load %arg9[%112, %c0_39, %c0_40] : memref<12x1x32xf32, #tpu.memory_space<vmem>>, vector<1x1x32xf32>
      %114 = vector.shape_cast %113 : vector<1x1x32xf32> to vector<1x32xf32>
      %115 = arith.index_cast %arg20 : i32 to index
      %c0_41 = arith.constant 0 : index
      %c0_42 = arith.constant 0 : index
      %116 = vector.load %arg10[%115, %c0_41, %c0_42] : memref<12x1x32xf32, #tpu.memory_space<vmem>>, vector<1x1x32xf32>
      %117 = vector.shape_cast %116 : vector<1x1x32xf32> to vector<1x32xf32>
      %cst_43 = arith.constant dense<0.000000e+00> : vector<16xf32>
      %118 = vector.multi_reduction <add>, %111, %cst_43 [1] : vector<16x32xf32> to vector<16xf32>
      %119 = vector.shape_cast %118 : vector<16xf32> to vector<16x1xf32>
      %cst_44 = arith.constant 3.200000e+01 : f32
      %120 = vector.broadcast %cst_44 : f32 to vector<16x1xf32>
      %121 = arith.divf %119, %120 : vector<16x1xf32>
      %122 = vector.broadcast %121 : vector<16x1xf32> to vector<16x32xf32>
      %123 = arith.subf %111, %122 : vector<16x32xf32>
      %124 = vector.broadcast %121 : vector<16x1xf32> to vector<16x32xf32>
      %125 = arith.subf %111, %124 : vector<16x32xf32>
      %126 = arith.mulf %123, %125 : vector<16x32xf32>
      %cst_45 = arith.constant dense<0.000000e+00> : vector<16xf32>
      %127 = vector.multi_reduction <add>, %126, %cst_45 [1] : vector<16x32xf32> to vector<16xf32>
      %128 = vector.shape_cast %127 : vector<16xf32> to vector<16x1xf32>
      %cst_46 = arith.constant 3.200000e+01 : f32
      %129 = vector.broadcast %cst_46 : f32 to vector<16x1xf32>
      %130 = arith.divf %128, %129 : vector<16x1xf32>
      %131 = vector.broadcast %121 : vector<16x1xf32> to vector<16x32xf32>
      %132 = arith.subf %111, %131 : vector<16x32xf32>
      %cst_47 = arith.constant 9.99999996E-13 : f32
      %133 = vector.broadcast %cst_47 : f32 to vector<16x1xf32>
      %134 = arith.addf %130, %133 : vector<16x1xf32>
      %135 = math.rsqrt %134 : vector<16x1xf32>
      %136 = vector.broadcast %135 : vector<16x1xf32> to vector<16x32xf32>
      %137 = arith.mulf %132, %136 : vector<16x32xf32>
      %138 = vector.broadcast %114 : vector<1x32xf32> to vector<16x32xf32>
      %139 = arith.mulf %137, %138 : vector<16x32xf32>
      %140 = vector.broadcast %117 : vector<1x32xf32> to vector<16x32xf32>
      %141 = arith.addf %139, %140 : vector<16x32xf32>
      %142 = arith.index_cast %arg20 : i32 to index
      %c0_48 = arith.constant 0 : index
      %c0_49 = arith.constant 0 : index
      %143 = vector.load %arg11[%142, %c0_48, %c0_49] : memref<12x32x64xf32, #tpu.memory_space<vmem>>, vector<1x32x64xf32>
      %144 = vector.shape_cast %143 : vector<1x32x64xf32> to vector<32x64xf32>
      %cst_50 = arith.constant dense<0.000000e+00> : vector<16x64xf32>
      %145 = tpu.matmul %141, %144, %cst_50 {dimension_numbers = #tpu.dot_dimension_numbers<[1], [0], [0], [1], [0, 0, 1, 1], [], []>} : vector<16x32xf32>, vector<32x64xf32>, vector<16x64xf32> -> vector<16x64xf32>
      %146 = arith.index_cast %arg20 : i32 to index
      %c0_51 = arith.constant 0 : index
      %c0_52 = arith.constant 0 : index
      %147 = vector.load %arg12[%146, %c0_51, %c0_52] : memref<12x1x64xf32, #tpu.memory_space<vmem>>, vector<1x1x64xf32>
      %148 = vector.shape_cast %147 : vector<1x1x64xf32> to vector<1x64xf32>
      %149 = vector.broadcast %148 : vector<1x64xf32> to vector<16x64xf32>
      %150 = arith.addf %145, %149 : vector<16x64xf32>
      %cst_53 = arith.constant 5.000000e-01 : f32
      %151 = vector.broadcast %cst_53 : f32 to vector<16x64xf32>
      %152 = arith.mulf %151, %150 : vector<16x64xf32>
      %cst_54 = arith.constant 4.471500e-02 : f32
      %153 = vector.broadcast %cst_54 : f32 to vector<16x64xf32>
      %154 = arith.mulf %153, %150 : vector<16x64xf32>
      %155 = arith.mulf %154, %150 : vector<16x64xf32>
      %156 = arith.mulf %155, %150 : vector<16x64xf32>
      %157 = arith.addf %150, %156 : vector<16x64xf32>
      %cst_55 = arith.constant 0.797884583 : f32
      %158 = vector.broadcast %cst_55 : f32 to vector<16x64xf32>
      %159 = arith.mulf %158, %157 : vector<16x64xf32>
      %160 = math.tanh %159 : vector<16x64xf32>
      %cst_56 = arith.constant 1.000000e+00 : f32
      %161 = vector.broadcast %cst_56 : f32 to vector<16x64xf32>
      %162 = arith.addf %161, %160 : vector<16x64xf32>
      %163 = arith.mulf %152, %162 : vector<16x64xf32>
      %164 = arith.index_cast %arg20 : i32 to index
      %c0_57 = arith.constant 0 : index
      %c0_58 = arith.constant 0 : index
      %165 = vector.load %arg13[%164, %c0_57, %c0_58] : memref<12x64x32xf32, #tpu.memory_space<vmem>>, vector<1x64x32xf32>
      %166 = vector.shape_cast %165 : vector<1x64x32xf32> to vector<64x32xf32>
      %cst_59 = arith.constant dense<0.000000e+00> : vector<16x32xf32>
      %167 = tpu.matmul %163, %166, %cst_59 {dimension_numbers = #tpu.dot_dimension_numbers<[1], [0], [0], [1], [0, 0, 1, 1], [], []>} : vector<16x64xf32>, vector<64x32xf32>, vector<16x32xf32> -> vector<16x32xf32>
      %168 = arith.index_cast %arg20 : i32 to index
      %c0_60 = arith.constant 0 : index
      %c0_61 = arith.constant 0 : index
      %169 = vector.load %arg14[%168, %c0_60, %c0_61] : memref<12x1x32xf32, #tpu.memory_space<vmem>>, vector<1x1x32xf32>
      %170 = vector.shape_cast %169 : vector<1x1x32xf32> to vector<1x32xf32>
      %171 = vector.broadcast %170 : vector<1x32xf32> to vector<16x32xf32>
      %172 = arith.addf %167, %171 : vector<16x32xf32>
      %173 = arith.addf %172, %141 : vector<16x32xf32>
      %174 = arith.index_cast %arg20 : i32 to index
      %c0_62 = arith.constant 0 : index
      %c0_63 = arith.constant 0 : index
      %175 = vector.load %arg15[%174, %c0_62, %c0_63] : memref<12x1x32xf32, #tpu.memory_space<vmem>>, vector<1x1x32xf32>
      %176 = vector.shape_cast %175 : vector<1x1x32xf32> to vector<1x32xf32>
      %177 = arith.index_cast %arg20 : i32 to index
      %c0_64 = arith.constant 0 : index
      %c0_65 = arith.constant 0 : index
      %178 = vector.load %arg16[%177, %c0_64, %c0_65] : memref<12x1x32xf32, #tpu.memory_space<vmem>>, vector<1x1x32xf32>
      %179 = vector.shape_cast %178 : vector<1x1x32xf32> to vector<1x32xf32>
      %cst_66 = arith.constant dense<0.000000e+00> : vector<16xf32>
      %180 = vector.multi_reduction <add>, %173, %cst_66 [1] : vector<16x32xf32> to vector<16xf32>
      %181 = vector.shape_cast %180 : vector<16xf32> to vector<16x1xf32>
      %cst_67 = arith.constant 3.200000e+01 : f32
      %182 = vector.broadcast %cst_67 : f32 to vector<16x1xf32>
      %183 = arith.divf %181, %182 : vector<16x1xf32>
      %184 = vector.broadcast %183 : vector<16x1xf32> to vector<16x32xf32>
      %185 = arith.subf %173, %184 : vector<16x32xf32>
      %186 = vector.broadcast %183 : vector<16x1xf32> to vector<16x32xf32>
      %187 = arith.subf %173, %186 : vector<16x32xf32>
      %188 = arith.mulf %185, %187 : vector<16x32xf32>
      %cst_68 = arith.constant dense<0.000000e+00> : vector<16xf32>
      %189 = vector.multi_reduction <add>, %188, %cst_68 [1] : vector<16x32xf32> to vector<16xf32>
      %190 = vector.shape_cast %189 : vector<16xf32> to vector<16x1xf32>
      %cst_69 = arith.constant 3.200000e+01 : f32
      %191 = vector.broadcast %cst_69 : f32 to vector<16x1xf32>
      %192 = arith.divf %190, %191 : vector<16x1xf32>
      %193 = vector.broadcast %183 : vector<16x1xf32> to vector<16x32xf32>
      %194 = arith.subf %173, %193 : vector<16x32xf32>
      %cst_70 = arith.constant 9.99999996E-13 : f32
      %195 = vector.broadcast %cst_70 : f32 to vector<16x1xf32>
      %196 = arith.addf %192, %195 : vector<16x1xf32>
      %197 = math.rsqrt %196 : vector<16x1xf32>
      %198 = vector.broadcast %197 : vector<16x1xf32> to vector<16x32xf32>
      %199 = arith.mulf %194, %198 : vector<16x32xf32>
      %200 = vector.broadcast %176 : vector<1x32xf32> to vector<16x32xf32>
      %201 = arith.mulf %199, %200 : vector<16x32xf32>
      %202 = vector.broadcast %179 : vector<1x32xf32> to vector<16x32xf32>
      %203 = arith.addf %201, %202 : vector<16x32xf32>
      scf.yield %203 : vector<16x32xf32>
    }
    %c8_i32_12 = arith.constant 8 : i32
    %cst_13 = arith.constant 0xFF800000 : f32
    %30 = vector.broadcast %cst_13 : f32 to vector<2x32xf32>
    %c8_i32_14 = arith.constant 8 : i32
    %c4_i32 = arith.constant 4 : i32
    %31 = arith.addi %c8_i32_14, %c4_i32 : i32
    %c1_i32_15 = arith.constant 1 : i32
    %32:2 = scf.for %arg20 = %c8_i32_14 to %31 step %c1_i32_15 iter_args(%arg21 = %29, %arg22 = %30) -> (vector<16x32xf32>, vector<2x32xf32>)  : i32 {
      %39 = arith.index_cast %arg20 : i32 to index
      %c0_24 = arith.constant 0 : index
      %c0_25 = arith.constant 0 : index
      %40 = vector.load %arg5[%39, %c0_24, %c0_25] : memref<12x32x96xf32, #tpu.memory_space<vmem>>, vector<1x32x96xf32>
      %41 = vector.shape_cast %40 : vector<1x32x96xf32> to vector<32x96xf32>
      %cst_26 = arith.constant dense<0.000000e+00> : vector<16x96xf32>
      %42 = tpu.matmul %arg21, %41, %cst_26 {dimension_numbers = #tpu.dot_dimension_numbers<[1], [0], [0], [1], [0, 0, 1, 1], [], []>} : vector<16x32xf32>, vector<32x96xf32>, vector<16x96xf32> -> vector<16x96xf32>
      %43 = arith.index_cast %arg20 : i32 to index
      %c0_27 = arith.constant 0 : index
      %c0_28 = arith.constant 0 : index
      %44 = vector.load %arg6[%43, %c0_27, %c0_28] : memref<12x1x96xf32, #tpu.memory_space<vmem>>, vector<1x1x96xf32>
      %45 = vector.shape_cast %44 : vector<1x1x96xf32> to vector<1x96xf32>
      %46 = vector.broadcast %45 : vector<1x96xf32> to vector<16x96xf32>
      %47 = arith.addf %42, %46 : vector<16x96xf32>
      %48 = vector.extract_strided_slice %47 {offsets = [0, 0], sizes = [16, 8], strides = [1, 1]} : vector<16x96xf32> to vector<16x8xf32>
      %49 = vector.extract_strided_slice %47 {offsets = [0, 8], sizes = [16, 8], strides = [1, 1]} : vector<16x96xf32> to vector<16x8xf32>
      %50 = vector.extract_strided_slice %47 {offsets = [0, 16], sizes = [16, 8], strides = [1, 1]} : vector<16x96xf32> to vector<16x8xf32>
      %51 = vector.extract_strided_slice %47 {offsets = [0, 24], sizes = [16, 8], strides = [1, 1]} : vector<16x96xf32> to vector<16x8xf32>
      %52 = vector.shape_cast %48 : vector<16x8xf32> to vector<1x16x8xf32>
      %53 = vector.shape_cast %49 : vector<16x8xf32> to vector<1x16x8xf32>
      %54 = vector.shape_cast %50 : vector<16x8xf32> to vector<1x16x8xf32>
      %55 = vector.shape_cast %51 : vector<16x8xf32> to vector<1x16x8xf32>
      %56 = tpu.concatenate %52, %53, %54, %55 in 0 : vector<1x16x8xf32>, vector<1x16x8xf32>, vector<1x16x8xf32>, vector<1x16x8xf32> -> vector<4x16x8xf32>
      %57 = vector.shape_cast %56 : vector<4x16x8xf32> to vector<8x8x8xf32>
      %58 = vector.extract_strided_slice %47 {offsets = [0, 32], sizes = [16, 8], strides = [1, 1]} : vector<16x96xf32> to vector<16x8xf32>
      %59 = vector.extract_strided_slice %47 {offsets = [0, 40], sizes = [16, 8], strides = [1, 1]} : vector<16x96xf32> to vector<16x8xf32>
      %60 = vector.extract_strided_slice %47 {offsets = [0, 48], sizes = [16, 8], strides = [1, 1]} : vector<16x96xf32> to vector<16x8xf32>
      %61 = vector.extract_strided_slice %47 {offsets = [0, 56], sizes = [16, 8], strides = [1, 1]} : vector<16x96xf32> to vector<16x8xf32>
      %62 = vector.shape_cast %58 : vector<16x8xf32> to vector<1x16x8xf32>
      %63 = vector.shape_cast %59 : vector<16x8xf32> to vector<1x16x8xf32>
      %64 = vector.shape_cast %60 : vector<16x8xf32> to vector<1x16x8xf32>
      %65 = vector.shape_cast %61 : vector<16x8xf32> to vector<1x16x8xf32>
      %66 = tpu.concatenate %62, %63, %64, %65 in 0 : vector<1x16x8xf32>, vector<1x16x8xf32>, vector<1x16x8xf32>, vector<1x16x8xf32> -> vector<4x16x8xf32>
      %67 = vector.shape_cast %66 : vector<4x16x8xf32> to vector<8x8x8xf32>
      %68 = vector.extract_strided_slice %47 {offsets = [0, 64], sizes = [16, 8], strides = [1, 1]} : vector<16x96xf32> to vector<16x8xf32>
      %69 = vector.extract_strided_slice %47 {offsets = [0, 72], sizes = [16, 8], strides = [1, 1]} : vector<16x96xf32> to vector<16x8xf32>
      %70 = vector.extract_strided_slice %47 {offsets = [0, 80], sizes = [16, 8], strides = [1, 1]} : vector<16x96xf32> to vector<16x8xf32>
      %71 = vector.extract_strided_slice %47 {offsets = [0, 88], sizes = [16, 8], strides = [1, 1]} : vector<16x96xf32> to vector<16x8xf32>
      %72 = vector.shape_cast %68 : vector<16x8xf32> to vector<1x16x8xf32>
      %73 = vector.shape_cast %69 : vector<16x8xf32> to vector<1x16x8xf32>
      %74 = vector.shape_cast %70 : vector<16x8xf32> to vector<1x16x8xf32>
      %75 = vector.shape_cast %71 : vector<16x8xf32> to vector<1x16x8xf32>
      %76 = tpu.concatenate %72, %73, %74, %75 in 0 : vector<1x16x8xf32>, vector<1x16x8xf32>, vector<1x16x8xf32>, vector<1x16x8xf32> -> vector<4x16x8xf32>
      %77 = vector.shape_cast %76 : vector<4x16x8xf32> to vector<8x8x8xf32>
      "tpu.trace_start"() <{level = 10 : i32, message = "bqd,bkd->bqk"}> : () -> ()
      %cst_29 = arith.constant dense<0.000000e+00> : vector<8x8x8xf32>
      %78 = tpu.matmul %57, %67, %cst_29 {dimension_numbers = #tpu.dot_dimension_numbers<[2], [2], [1], [1], [0, 0, 0, 1, 1, 1], [0], [0]>} : vector<8x8x8xf32>, vector<8x8x8xf32>, vector<8x8x8xf32> -> vector<8x8x8xf32>
      "tpu.trace_stop"() : () -> ()
      %cst_30 = arith.constant 0.353553385 : f32
      %79 = vector.broadcast %cst_30 : f32 to vector<8x8x8xf32>
      %80 = arith.mulf %78, %79 : vector<8x8x8xf32>
      %81 = arith.addf %80, %0 : vector<8x8x8xf32>
      %cst_31 = arith.constant dense<0xFF800000> : vector<8x8xf32>
      %82 = vector.multi_reduction <maximumf>, %81, %cst_31 [2] : vector<8x8x8xf32> to vector<8x8xf32>
      %83 = vector.shape_cast %82 : vector<8x8xf32> to vector<8x8x1xf32>
      %84 = vector.broadcast %83 : vector<8x8x1xf32> to vector<8x8x8xf32>
      %85 = arith.subf %81, %84 : vector<8x8x8xf32>
      %86 = math.exp %85 : vector<8x8x8xf32>
      %cst_32 = arith.constant dense<0.000000e+00> : vector<8x8xf32>
      %87 = vector.multi_reduction <add>, %86, %cst_32 [2] : vector<8x8x8xf32> to vector<8x8xf32>
      %88 = vector.shape_cast %87 : vector<8x8xf32> to vector<8x8x1xf32>
      %89 = vector.broadcast %88 : vector<8x8x1xf32> to vector<8x8x8xf32>
      %90 = arith.divf %86, %89 : vector<8x8x8xf32>
      "tpu.trace_start"() <{level = 10 : i32, message = "bqk,bkd->bqd"}> : () -> ()
      %cst_33 = arith.constant dense<0.000000e+00> : vector<8x8x8xf32>
      %91 = tpu.matmul %90, %77, %cst_33 {dimension_numbers = #tpu.dot_dimension_numbers<[2], [1], [1], [2], [0, 0, 0, 1, 1, 2], [0], [0]>} : vector<8x8x8xf32>, vector<8x8x8xf32>, vector<8x8x8xf32> -> vector<8x8x8xf32>
      "tpu.trace_stop"() : () -> ()
      %92 = vector.shape_cast %91 : vector<8x8x8xf32> to vector<4x16x8xf32>
      %93 = vector.extract_strided_slice %92 {offsets = [0, 0, 0], sizes = [1, 16, 8], strides = [1, 1, 1]} : vector<4x16x8xf32> to vector<1x16x8xf32>
      %94 = vector.shape_cast %93 : vector<1x16x8xf32> to vector<16x8xf32>
      %95 = vector.extract_strided_slice %92 {offsets = [1, 0, 0], sizes = [1, 16, 8], strides = [1, 1, 1]} : vector<4x16x8xf32> to vector<1x16x8xf32>
      %96 = vector.shape_cast %95 : vector<1x16x8xf32> to vector<16x8xf32>
      %97 = vector.extract_strided_slice %92 {offsets = [2, 0, 0], sizes = [1, 16, 8], strides = [1, 1, 1]} : vector<4x16x8xf32> to vector<1x16x8xf32>
      %98 = vector.shape_cast %97 : vector<1x16x8xf32> to vector<16x8xf32>
      %99 = vector.extract_strided_slice %92 {offsets = [3, 0, 0], sizes = [1, 16, 8], strides = [1, 1, 1]} : vector<4x16x8xf32> to vector<1x16x8xf32>
      %100 = vector.shape_cast %99 : vector<1x16x8xf32> to vector<16x8xf32>
      %101 = tpu.concatenate %94, %96, %98, %100 in 1 : vector<16x8xf32>, vector<16x8xf32>, vector<16x8xf32>, vector<16x8xf32> -> vector<16x32xf32>
      %102 = arith.index_cast %arg20 : i32 to index
      %c0_34 = arith.constant 0 : index
      %c0_35 = arith.constant 0 : index
      %103 = vector.load %arg7[%102, %c0_34, %c0_35] : memref<12x32x32xf32, #tpu.memory_space<vmem>>, vector<1x32x32xf32>
      %104 = vector.shape_cast %103 : vector<1x32x32xf32> to vector<32x32xf32>
      %cst_36 = arith.constant dense<0.000000e+00> : vector<16x32xf32>
      %105 = tpu.matmul %101, %104, %cst_36 {dimension_numbers = #tpu.dot_dimension_numbers<[1], [0], [0], [1], [0, 0, 1, 1], [], []>} : vector<16x32xf32>, vector<32x32xf32>, vector<16x32xf32> -> vector<16x32xf32>
      %106 = arith.index_cast %arg20 : i32 to index
      %c0_37 = arith.constant 0 : index
      %c0_38 = arith.constant 0 : index
      %107 = vector.load %arg8[%106, %c0_37, %c0_38] : memref<12x1x32xf32, #tpu.memory_space<vmem>>, vector<1x1x32xf32>
      %108 = vector.shape_cast %107 : vector<1x1x32xf32> to vector<1x32xf32>
      %109 = vector.broadcast %108 : vector<1x32xf32> to vector<16x32xf32>
      %110 = arith.addf %105, %109 : vector<16x32xf32>
      %111 = arith.addf %110, %arg21 : vector<16x32xf32>
      %112 = arith.index_cast %arg20 : i32 to index
      %c0_39 = arith.constant 0 : index
      %c0_40 = arith.constant 0 : index
      %113 = vector.load %arg9[%112, %c0_39, %c0_40] : memref<12x1x32xf32, #tpu.memory_space<vmem>>, vector<1x1x32xf32>
      %114 = vector.shape_cast %113 : vector<1x1x32xf32> to vector<1x32xf32>
      %115 = arith.index_cast %arg20 : i32 to index
      %c0_41 = arith.constant 0 : index
      %c0_42 = arith.constant 0 : index
      %116 = vector.load %arg10[%115, %c0_41, %c0_42] : memref<12x1x32xf32, #tpu.memory_space<vmem>>, vector<1x1x32xf32>
      %117 = vector.shape_cast %116 : vector<1x1x32xf32> to vector<1x32xf32>
      %cst_43 = arith.constant dense<0.000000e+00> : vector<16xf32>
      %118 = vector.multi_reduction <add>, %111, %cst_43 [1] : vector<16x32xf32> to vector<16xf32>
      %119 = vector.shape_cast %118 : vector<16xf32> to vector<16x1xf32>
      %cst_44 = arith.constant 3.200000e+01 : f32
      %120 = vector.broadcast %cst_44 : f32 to vector<16x1xf32>
      %121 = arith.divf %119, %120 : vector<16x1xf32>
      %122 = vector.broadcast %121 : vector<16x1xf32> to vector<16x32xf32>
      %123 = arith.subf %111, %122 : vector<16x32xf32>
      %124 = vector.broadcast %121 : vector<16x1xf32> to vector<16x32xf32>
      %125 = arith.subf %111, %124 : vector<16x32xf32>
      %126 = arith.mulf %123, %125 : vector<16x32xf32>
      %cst_45 = arith.constant dense<0.000000e+00> : vector<16xf32>
      %127 = vector.multi_reduction <add>, %126, %cst_45 [1] : vector<16x32xf32> to vector<16xf32>
      %128 = vector.shape_cast %127 : vector<16xf32> to vector<16x1xf32>
      %cst_46 = arith.constant 3.200000e+01 : f32
      %129 = vector.broadcast %cst_46 : f32 to vector<16x1xf32>
      %130 = arith.divf %128, %129 : vector<16x1xf32>
      %131 = vector.broadcast %121 : vector<16x1xf32> to vector<16x32xf32>
      %132 = arith.subf %111, %131 : vector<16x32xf32>
      %cst_47 = arith.constant 9.99999996E-13 : f32
      %133 = vector.broadcast %cst_47 : f32 to vector<16x1xf32>
      %134 = arith.addf %130, %133 : vector<16x1xf32>
      %135 = math.rsqrt %134 : vector<16x1xf32>
      %136 = vector.broadcast %135 : vector<16x1xf32> to vector<16x32xf32>
      %137 = arith.mulf %132, %136 : vector<16x32xf32>
      %138 = vector.broadcast %114 : vector<1x32xf32> to vector<16x32xf32>
      %139 = arith.mulf %137, %138 : vector<16x32xf32>
      %140 = vector.broadcast %117 : vector<1x32xf32> to vector<16x32xf32>
      %141 = arith.addf %139, %140 : vector<16x32xf32>
      %142 = arith.index_cast %arg20 : i32 to index
      %c0_48 = arith.constant 0 : index
      %c0_49 = arith.constant 0 : index
      %143 = vector.load %arg11[%142, %c0_48, %c0_49] : memref<12x32x64xf32, #tpu.memory_space<vmem>>, vector<1x32x64xf32>
      %144 = vector.shape_cast %143 : vector<1x32x64xf32> to vector<32x64xf32>
      %cst_50 = arith.constant dense<0.000000e+00> : vector<16x64xf32>
      %145 = tpu.matmul %141, %144, %cst_50 {dimension_numbers = #tpu.dot_dimension_numbers<[1], [0], [0], [1], [0, 0, 1, 1], [], []>} : vector<16x32xf32>, vector<32x64xf32>, vector<16x64xf32> -> vector<16x64xf32>
      %146 = arith.index_cast %arg20 : i32 to index
      %c0_51 = arith.constant 0 : index
      %c0_52 = arith.constant 0 : index
      %147 = vector.load %arg12[%146, %c0_51, %c0_52] : memref<12x1x64xf32, #tpu.memory_space<vmem>>, vector<1x1x64xf32>
      %148 = vector.shape_cast %147 : vector<1x1x64xf32> to vector<1x64xf32>
      %149 = vector.broadcast %148 : vector<1x64xf32> to vector<16x64xf32>
      %150 = arith.addf %145, %149 : vector<16x64xf32>
      %cst_53 = arith.constant 5.000000e-01 : f32
      %151 = vector.broadcast %cst_53 : f32 to vector<16x64xf32>
      %152 = arith.mulf %151, %150 : vector<16x64xf32>
      %cst_54 = arith.constant 4.471500e-02 : f32
      %153 = vector.broadcast %cst_54 : f32 to vector<16x64xf32>
      %154 = arith.mulf %153, %150 : vector<16x64xf32>
      %155 = arith.mulf %154, %150 : vector<16x64xf32>
      %156 = arith.mulf %155, %150 : vector<16x64xf32>
      %157 = arith.addf %150, %156 : vector<16x64xf32>
      %cst_55 = arith.constant 0.797884583 : f32
      %158 = vector.broadcast %cst_55 : f32 to vector<16x64xf32>
      %159 = arith.mulf %158, %157 : vector<16x64xf32>
      %160 = math.tanh %159 : vector<16x64xf32>
      %cst_56 = arith.constant 1.000000e+00 : f32
      %161 = vector.broadcast %cst_56 : f32 to vector<16x64xf32>
      %162 = arith.addf %161, %160 : vector<16x64xf32>
      %163 = arith.mulf %152, %162 : vector<16x64xf32>
      %164 = arith.index_cast %arg20 : i32 to index
      %c0_57 = arith.constant 0 : index
      %c0_58 = arith.constant 0 : index
      %165 = vector.load %arg13[%164, %c0_57, %c0_58] : memref<12x64x32xf32, #tpu.memory_space<vmem>>, vector<1x64x32xf32>
      %166 = vector.shape_cast %165 : vector<1x64x32xf32> to vector<64x32xf32>
      %cst_59 = arith.constant dense<0.000000e+00> : vector<16x32xf32>
      %167 = tpu.matmul %163, %166, %cst_59 {dimension_numbers = #tpu.dot_dimension_numbers<[1], [0], [0], [1], [0, 0, 1, 1], [], []>} : vector<16x64xf32>, vector<64x32xf32>, vector<16x32xf32> -> vector<16x32xf32>
      %168 = arith.index_cast %arg20 : i32 to index
      %c0_60 = arith.constant 0 : index
      %c0_61 = arith.constant 0 : index
      %169 = vector.load %arg14[%168, %c0_60, %c0_61] : memref<12x1x32xf32, #tpu.memory_space<vmem>>, vector<1x1x32xf32>
      %170 = vector.shape_cast %169 : vector<1x1x32xf32> to vector<1x32xf32>
      %171 = vector.broadcast %170 : vector<1x32xf32> to vector<16x32xf32>
      %172 = arith.addf %167, %171 : vector<16x32xf32>
      %173 = arith.addf %172, %141 : vector<16x32xf32>
      %174 = arith.index_cast %arg20 : i32 to index
      %c0_62 = arith.constant 0 : index
      %c0_63 = arith.constant 0 : index
      %175 = vector.load %arg15[%174, %c0_62, %c0_63] : memref<12x1x32xf32, #tpu.memory_space<vmem>>, vector<1x1x32xf32>
      %176 = vector.shape_cast %175 : vector<1x1x32xf32> to vector<1x32xf32>
      %177 = arith.index_cast %arg20 : i32 to index
      %c0_64 = arith.constant 0 : index
      %c0_65 = arith.constant 0 : index
      %178 = vector.load %arg16[%177, %c0_64, %c0_65] : memref<12x1x32xf32, #tpu.memory_space<vmem>>, vector<1x1x32xf32>
      %179 = vector.shape_cast %178 : vector<1x1x32xf32> to vector<1x32xf32>
      %cst_66 = arith.constant dense<0.000000e+00> : vector<16xf32>
      %180 = vector.multi_reduction <add>, %173, %cst_66 [1] : vector<16x32xf32> to vector<16xf32>
      %181 = vector.shape_cast %180 : vector<16xf32> to vector<16x1xf32>
      %cst_67 = arith.constant 3.200000e+01 : f32
      %182 = vector.broadcast %cst_67 : f32 to vector<16x1xf32>
      %183 = arith.divf %181, %182 : vector<16x1xf32>
      %184 = vector.broadcast %183 : vector<16x1xf32> to vector<16x32xf32>
      %185 = arith.subf %173, %184 : vector<16x32xf32>
      %186 = vector.broadcast %183 : vector<16x1xf32> to vector<16x32xf32>
      %187 = arith.subf %173, %186 : vector<16x32xf32>
      %188 = arith.mulf %185, %187 : vector<16x32xf32>
      %cst_68 = arith.constant dense<0.000000e+00> : vector<16xf32>
      %189 = vector.multi_reduction <add>, %188, %cst_68 [1] : vector<16x32xf32> to vector<16xf32>
      %190 = vector.shape_cast %189 : vector<16xf32> to vector<16x1xf32>
      %cst_69 = arith.constant 3.200000e+01 : f32
      %191 = vector.broadcast %cst_69 : f32 to vector<16x1xf32>
      %192 = arith.divf %190, %191 : vector<16x1xf32>
      %193 = vector.broadcast %183 : vector<16x1xf32> to vector<16x32xf32>
      %194 = arith.subf %173, %193 : vector<16x32xf32>
      %cst_70 = arith.constant 9.99999996E-13 : f32
      %195 = vector.broadcast %cst_70 : f32 to vector<16x1xf32>
      %196 = arith.addf %192, %195 : vector<16x1xf32>
      %197 = math.rsqrt %196 : vector<16x1xf32>
      %198 = vector.broadcast %197 : vector<16x1xf32> to vector<16x32xf32>
      %199 = arith.mulf %194, %198 : vector<16x32xf32>
      %200 = vector.broadcast %176 : vector<1x32xf32> to vector<16x32xf32>
      %201 = arith.mulf %199, %200 : vector<16x32xf32>
      %202 = vector.broadcast %179 : vector<1x32xf32> to vector<16x32xf32>
      %203 = arith.addf %201, %202 : vector<16x32xf32>
      %204 = vector.shape_cast %203 : vector<16x32xf32> to vector<2x8x32xf32>
      %cst_71 = arith.constant dense<0xFF800000> : vector<2x32xf32>
      %205 = vector.multi_reduction <maximumf>, %204, %cst_71 [1] : vector<2x8x32xf32> to vector<2x32xf32>
      %206 = arith.maximumf %arg22, %205 : vector<2x32xf32>
      scf.yield %203, %206 : vector<16x32xf32>, vector<2x32xf32>
    }
    %c4_i32_16 = arith.constant 4 : i32
    %c0_17 = arith.constant 0 : index
    %c0_18 = arith.constant 0 : index
    %33 = vector.load %arg17[%c0_17, %c0_18] : memref<32x8xf32, #tpu.memory_space<vmem>>, vector<32x8xf32>
    %cst_19 = arith.constant dense<0.000000e+00> : vector<2x8xf32>
    %34 = tpu.matmul %32#1, %33, %cst_19 {dimension_numbers = #tpu.dot_dimension_numbers<[1], [0], [0], [1], [0, 0, 1, 1], [], []>} : vector<2x32xf32>, vector<32x8xf32>, vector<2x8xf32> -> vector<2x8xf32>
    %c0_20 = arith.constant 0 : index
    %c0_21 = arith.constant 0 : index
    %35 = vector.load %arg18[%c0_20, %c0_21] : memref<1x8xf32, #tpu.memory_space<vmem>>, vector<1x8xf32>
    %36 = vector.broadcast %35 : vector<1x8xf32> to vector<2x8xf32>
    %37 = arith.addf %34, %36 : vector<2x8xf32>
    %c0_22 = arith.constant 0 : index
    %c0_23 = arith.constant 0 : index
    %38 = vector.load %arg19[%c0_22, %c0_23] : memref<2x8xf32, #tpu.memory_space<vmem>>, vector<2x8xf32>
    tpu.vector_store %arg19[%c0_22, %c0_23], %37 {strides = array<i32>} : memref<2x8xf32, #tpu.memory_space<vmem>>, vector<2x8xf32>,
    return
  }
  func.func @transform_0(%arg0: i32) -> (i32, i32) {
    %c0_i32 = arith.constant 0 : i32
    %c0_i32_0 = arith.constant 0 : i32
    %c0_i32_1 = arith.constant 0 : i32
    return %c0_i32, %c0_i32_0 : i32, i32
  }
  func.func @transform_1(%arg0: i32) -> (i32, i32) {
    %c0_i32 = arith.constant 0 : i32
    %c0_i32_0 = arith.constant 0 : i32
    %c0_i32_1 = arith.constant 0 : i32
    return %c0_i32, %c0_i32_0 : i32, i32
  }
  func.func @transform_2(%arg0: i32) -> (i32, i32) {
    %c0_i32 = arith.constant 0 : i32
    %c0_i32_0 = arith.constant 0 : i32
    %c0_i32_1 = arith.constant 0 : i32
    return %c0_i32, %c0_i32_0 : i32, i32
  }
  func.func @transform_3(%arg0: i32) -> (i32, i32, i32) {
    %c0_i32 = arith.constant 0 : i32
    %c0_i32_0 = arith.constant 0 : i32
    %c0_i32_1 = arith.constant 0 : i32
    %c0_i32_2 = arith.constant 0 : i32
    return %c0_i32, %c0_i32_0, %c0_i32_1 : i32, i32, i32
  }
  func.func @transform_4(%arg0: i32) -> (i32, i32, i32) {
    %c0_i32 = arith.constant 0 : i32
    %c0_i32_0 = arith.constant 0 : i32
    %c0_i32_1 = arith.constant 0 : i32
    %c0_i32_2 = arith.constant 0 : i32
    return %c0_i32, %c0_i32_0, %c0_i32_1 : i32, i32, i32
  }
  func.func @transform_5(%arg0: i32) -> (i32, i32, i32) {
    %c0_i32 = arith.constant 0 : i32
    %c0_i32_0 = arith.constant 0 : i32
    %c0_i32_1 = arith.constant 0 : i32
    %c0_i32_2 = arith.constant 0 : i32
    return %c0_i32, %c0_i32_0, %c0_i32_1 : i32, i32, i32
  }
  func.func @transform_6(%arg0: i32) -> (i32, i32, i32) {
    %c0_i32 = arith.constant 0 : i32
    %c0_i32_0 = arith.constant 0 : i32
    %c0_i32_1 = arith.constant 0 : i32
    %c0_i32_2 = arith.constant 0 : i32
    return %c0_i32, %c0_i32_0, %c0_i32_1 : i32, i32, i32
  }
  func.func @transform_7(%arg0: i32) -> (i32, i32, i32) {
    %c0_i32 = arith.constant 0 : i32
    %c0_i32_0 = arith.constant 0 : i32
    %c0_i32_1 = arith.constant 0 : i32
    %c0_i32_2 = arith.constant 0 : i32
    return %c0_i32, %c0_i32_0, %c0_i32_1 : i32, i32, i32
  }
  func.func @transform_8(%arg0: i32) -> (i32, i32, i32) {
    %c0_i32 = arith.constant 0 : i32
    %c0_i32_0 = arith.constant 0 : i32
    %c0_i32_1 = arith.constant 0 : i32
    %c0_i32_2 = arith.constant 0 : i32
    return %c0_i32, %c0_i32_0, %c0_i32_1 : i32, i32, i32
  }
  func.func @transform_9(%arg0: i32) -> (i32, i32, i32) {
    %c0_i32 = arith.constant 0 : i32
    %c0_i32_0 = arith.constant 0 : i32
    %c0_i32_1 = arith.constant 0 : i32
    %c0_i32_2 = arith.constant 0 : i32
    return %c0_i32, %c0_i32_0, %c0_i32_1 : i32, i32, i32
  }
  func.func @transform_10(%arg0: i32) -> (i32, i32, i32) {
    %c0_i32 = arith.constant 0 : i32
    %c0_i32_0 = arith.constant 0 : i32
    %c0_i32_1 = arith.constant 0 : i32
    %c0_i32_2 = arith.constant 0 : i32
    return %c0_i32, %c0_i32_0, %c0_i32_1 : i32, i32, i32
  }
  func.func @transform_11(%arg0: i32) -> (i32, i32, i32) {
    %c0_i32 = arith.constant 0 : i32
    %c0_i32_0 = arith.constant 0 : i32
    %c0_i32_1 = arith.constant 0 : i32
    %c0_i32_2 = arith.constant 0 : i32
    return %c0_i32, %c0_i32_0, %c0_i32_1 : i32, i32, i32
  }
  func.func @transform_12(%arg0: i32) -> (i32, i32, i32) {
    %c0_i32 = arith.constant 0 : i32
    %c0_i32_0 = arith.constant 0 : i32
    %c0_i32_1 = arith.constant 0 : i32
    %c0_i32_2 = arith.constant 0 : i32
    return %c0_i32, %c0_i32_0, %c0_i32_1 : i32, i32, i32
  }
  func.func @transform_13(%arg0: i32) -> (i32, i32, i32) {
    %c0_i32 = arith.constant 0 : i32
    %c0_i32_0 = arith.constant 0 : i32
    %c0_i32_1 = arith.constant 0 : i32
    %c0_i32_2 = arith.constant 0 : i32
    return %c0_i32, %c0_i32_0, %c0_i32_1 : i32, i32, i32
  }
  func.func @transform_14(%arg0: i32) -> (i32, i32, i32) {
    %c0_i32 = arith.constant 0 : i32
    %c0_i32_0 = arith.constant 0 : i32
    %c0_i32_1 = arith.constant 0 : i32
    %c0_i32_2 = arith.constant 0 : i32
    return %c0_i32, %c0_i32_0, %c0_i32_1 : i32, i32, i32
  }
  func.func @transform_15(%arg0: i32) -> (i32, i32, i32) {
    %c0_i32 = arith.constant 0 : i32
    %c0_i32_0 = arith.constant 0 : i32
    %c0_i32_1 = arith.constant 0 : i32
    %c0_i32_2 = arith.constant 0 : i32
    return %c0_i32, %c0_i32_0, %c0_i32_1 : i32, i32, i32
  }
  func.func @transform_16(%arg0: i32) -> (i32, i32) {
    %c0_i32 = arith.constant 0 : i32
    %c0_i32_0 = arith.constant 0 : i32
    %c0_i32_1 = arith.constant 0 : i32
    return %c0_i32, %c0_i32_0 : i32, i32
  }
  func.func @transform_17(%arg0: i32) -> (i32, i32) {
    %c0_i32 = arith.constant 0 : i32
    %c0_i32_0 = arith.constant 0 : i32
    %c0_i32_1 = arith.constant 0 : i32
    return %c0_i32, %c0_i32_0 : i32, i32
  }
  func.func @transform_18(%arg0: i32) -> (i32, i32) {
    %c0_i32 = arith.constant 0 : i32
    %c0_i32_0 = arith.constant 0 : i32
    %c0_i32_1 = arith.constant 0 : i32
    return %c0_i32, %c0_i32_0 : i32, i32
  }
}

</mosaic_0001>

<bundles_post_ra>
// kernel: forward.1
= control target key start
LH: loop header
LB: loop body
LE: loop exit
PB: predicated region body
PF: predicated region fallthrough
CT: control target
= control target key end

     0   :  { %s5634_s0 = inlined_call_operand.vmem [shape: f32[16,32], index: 0, kind: input, shape index: {}]   ;;  %s5635_s1 = inlined_call_operand.vmem [shape: f32[1,32], index: 1, kind: input, shape index: {}]   ;;  %s5636_s2 = inlined_call_operand.vmem [shape: f32[1,32], index: 2, kind: input, shape index: {}]   ;;  %s5637_s3 = inlined_call_operand.vmem [shape: f32[8,8,8], index: 3, kind: input, shape index: {}]   ;;  %s5638_s4 = inlined_call_operand.vmem [shape: f32[12,32,96], index: 4, kind: input, shape index: {}]   ;;  %s5639_s5 = inlined_call_operand.vmem [shape: f32[12,1,96], index: 5, kind: input, shape index: {}]   ;;  %s5640_s6 = inlined_call_operand.vmem [shape: f32[12,32,32], index: 6, kind: input, shape index: {}]   ;;  %s5641_s7 = inlined_call_operand.vmem [shape: f32[12,1,32], index: 7, kind: input, shape index: {}]   ;;  %s5642_s8 = inlined_call_operand.vmem [shape: f32[12,1,32], index: 8, kind: input, shape index: {}]   ;;  %s5643_s9 = inlined_call_operand.vmem [shape: f32[12,1,32], index: 9, kind: input, shape index: {}]   ;;  %s5644_s10 = inlined_call_operand.vmem [shape: f32[12,32,64], index: 10, kind: input, shape index: {}]   ;;  %s5645_s11 = inlined_call_operand.vmem [shape: f32[12,1,64], index: 11, kind: input, shape index: {}]   ;;  %s5646_s12 = inlined_call_operand.vmem [shape: f32[12,64,32], index: 12, kind: input, shape index: {}]   ;;  %s5647_s13 = inlined_call_operand.vmem [shape: f32[12,1,32], index: 13, kind: input, shape index: {}]   ;;  %s5648_s14 = inlined_call_operand.vmem [shape: f32[12,1,32], index: 14, kind: input, shape index: {}]   ;;  %s5649_s15 = inlined_call_operand.vmem [shape: f32[12,1,32], index: 15, kind: input, shape index: {}]   ;;  %s5650_s16 = inlined_call_operand.vmem [shape: f32[32,8], index: 16, kind: input, shape index: {}]   ;;  %s5651_s17 = inlined_call_operand.vmem [shape: f32[1,8], index: 17, kind: input, shape index: {}]   ;;  %s5652_s18 = inlined_call_operand.hbm [shape: f32[2,8], index: 18, kind: output, shape index: {}]  }
   0x1   :  { %5654 = sst [smem:[#allocation5_spill]] %s5634_s0 }
   0x2   :  { %5655 = sst [smem:[#allocation6_spill]] %s5635_s1 }
   0x3   :  { %5656 = sst [smem:[#allocation7_spill]] %s5636_s2 }
   0x4   :  { %s5657_s29 = sld [smem:[#allocation5_spill]]  ;;  %vm72_vm0 = vcmask 261120  }
   0xa   :  { %v68_v0 = vld [vmem:[%s5657_s29] sm:$0xff]  ;;  %v69_v1 = vld [vmem:[%s5657_s29 + $0x8] sm:$0xff] }
   0xb   :  { %23 = vsyncpa [#allocation3], 0  ;;  %v73_v2 = vsel %vm72_vm0, %v68_v0, 0.0  ;;  %v76_v3 = vsel %vm72_vm0, %v69_v1, 0.0  ;;  %v5015_v14 = vld [vmem:[%s5637_s3] sm:$0xff]  ;;  %v5020_v15 = vld [vmem:[%s5637_s3 + $0x8] sm:$0xff] }
   0xc   :  { %74 = vadd.xlane.f32.xlu0 %v73_v2  ;;  %v5025_v16 = vld [vmem:[%s5637_s3 + $0x10] sm:$0xff]  ;;  %v5030_v17 = vld [vmem:[%s5637_s3 + $0x18] sm:$0xff]  ;;  %v5035_v18 = vld [vmem:[%s5637_s3 + $0x20] sm:$0xff]  ;;  %s5658_s21 = sld [smem:[#allocation6_spill]]  ;;  %s5659_s23 = sld [smem:[#allocation7_spill]] }
   0xd   :  { %v5040_v19 = vld [vmem:[%s5637_s3 + $0x28] sm:$0xff]  ;;  %v5045_v20 = vld [vmem:[%s5637_s3 + $0x30] sm:$0xff]  ;;  %v5050_v21 = vld [vmem:[%s5637_s3 + $0x38] sm:$0xff]  ;;  %s5062_s3 = smov 0  }
  0x10   :  { %77 = vadd.xlane.f32.xlu0 %v76_v3 }
  0x12   :  { %v4041_v29 = vld [vmem:[%s5658_s21] ss:$0 sm:$0xff] }
  0x13   :  { %v4042_v31 = vld [vmem:[%s5659_s23] ss:$0 sm:$0xff] }
  0x99   :  { %v75_v4 = vpop.xlane.xlu0 %74 }
  0x9a   :  { %v80_v5 = vmul.f32 0.03125, %v75_v4 }
  0x9c   :  { %v82_v6 = vsub.f32 %v68_v0, %v80_v5 }
  0x9d   :  { %v78_v7 = vpop.xlane.xlu0 %77 }
  0x9e   :  { %v81_v8 = vmul.f32 0.03125, %v78_v7  ;;  %v84_v9 = vmul.f32 %v82_v6, %v82_v6 }
  0xa0   :  { %v83_v10 = vsub.f32 %v69_v1, %v81_v8  ;;  %v86_v11 = vsel %vm72_vm0, %v84_v9, 0.0 }
  0xa1   :  { %87 = vadd.xlane.f32.xlu1 %v86_v11 }
  0xa2   :  { %v85_v12 = vmul.f32 %v83_v10, %v83_v10 }
  0xa4   :  { %v89_v13 = vsel %vm72_vm0, %v85_v12, 0.0 }
  0xa5   :  { %90 = vadd.xlane.f32.xlu1 %v89_v13 }
 0x12e   :  { %v88_v22 = vpop.xlane.xlu1 %87 }
 0x12f   :  { %v92_v23 = vmul.f32 0.03125, %v88_v22 }
 0x131   :  { %v94_v24 = vadd.f32 1e-12, %v92_v23 }
 0x132   :  { %v91_v25 = vpop.xlane.xlu1 %90 }
 0x133   :  { %4703 = vrsqrt.f32 %v94_v24  ;;  %v93_v26 = vmul.f32 0.03125, %v91_v25 }
 0x135   :  { %v95_v27 = vadd.f32 1e-12, %v93_v26 }
 0x137   :  { %4705 = vrsqrt.f32 %v95_v27 }
 0x13d   :  { %v4704_v28 = vpop.eup %4703 }
 0x13e   :  { %v98_v30 = vmul.f32 %v4704_v28, %v82_v6 }
 0x140   :  { %v106_v32 = vmul.f32 %v4041_v29, %v98_v30 }
 0x141   :  { %v4706_v33 = vpop.eup %4705 }
 0x142   :  { %v114_v34 = vadd.f32 %v4042_v31, %v106_v32   ;;  %v99_v35 = vmul.f32 %v4706_v33, %v83_v10 }
 0x144   :  { %v107_v36 = vmul.f32 %v4041_v29, %v99_v35 }
 0x146   :  { %v115_v37 = vadd.f32 %v4042_v31, %v107_v36  }
 0x147 LB: > { %s5074_s24 = sshll.u32 %s4861_s3, 5  ;;  %4262 = vmatprep.mubr.msk.f32.mxu1 %vm72_vm0, %v4857_v34  ;;  %s130_s30 = scalar_lea.vmem %s5639_s5, %s4861_s3  ;;  %v4883_v46 = vmov 0.0   ;;  %vm4886_vm1 = vmmov 0   ;;  %vm235_vm2 = vcmask 64512   ;;  %vm1580_vm3 = vcmask 130048   ;;  %s4861_s3 = sphi %s5062_s3, %s121_s3   ;;  %v4857_v34 = vphi %v114_v34, %v5661_v34   ;;  %v4853_v37 = vphi %v115_v37, %v5660_v37  }
 0x148   : > { %s125_s27 = scalar_lea.vmem %s5638_s4, %s5074_s24  ;;  %v4044_v44 = vld [vmem:[%s130_s30] ss:$0 sm:$0xff]  ;;  %4275 = vmatprep.subr.mxu0 %v4883_v46  ;;  %s4884_s0 = smov 112   ;;  %4277 = vmatprep.mubr.msk.f32.mxu0 %vm4886_vm1, %v4883_v46  ;;  %vm1583_vm4 = vcmask 195584   ;;  %vm1858_vm5 = vcmask 523264  }
 0x149   : > { %v126_v38 = vld [vmem:[%s125_s27] sm:$0xff]  ;;  %v127_v39 = vld [vmem:[%s125_s27 + $0x8] sm:$0xff]  ;;  %v128_v40 = vld [vmem:[%s125_s27 + $0x10] sm:$0xff]  ;;  %s4885_s19 = smov 120   ;;  %s4887_s1 = smov 104  }
 0x14a   : > { %v4529_v41 = vpack.c.bf16 %v127_v39, %v126_v38  ;;  %v129_v42 = vld [vmem:[%s125_s27 + $0x18] sm:$0xff]  ;;  %s4888_s20 = smov 96   ;;  %s4889_s21 = smov 64  }
 0x14b   : > { %v4533_v43 = vpack.c.bf16 %v129_v42, %v128_v40  ;;  %s1586_s23 = scalar_lea.vmem %s5640_s6, %s5074_s24  ;;  %s4890_s25 = smov 8  }
 0x14c   : > { %4530 = vmatprep.subr.bf16.mxu1 %v4529_v41  ;;  %s4891_s26 = smov 16   ;;  %s4892_s27 = smov 24  }
 0x14d   : > { %4532 = vmatpush3.bf16.msra.mxu1 %v4529_v41  ;;  %s1591_s30 = scalar_lea.vmem %s5641_s7, %s4861_s3  ;;  %s1942_s22 = scalar_lea.vmem %s5648_s14, %s4861_s3 }
 0x14e   : > { %4534 = vmatprep.subr.bf16.mxu1 %v4533_v43 }
 0x151   : > { %4536 = vmatpush3.bf16.msra.mxu1 %v4533_v43 }
 0x152   : > { %4265 = vmatprep.subr.mxu1 %v4883_v46 }
 0x154   : > { %4263 = vmatmul.mubr.msk.f32.vlgmr.msra.gmra.mrb[0].mxu1 %vm72_vm0, %v4853_v37 }
 0x155   : > { %4267 = vmatprep.mubr.msk.f32.mxu1 %vm4886_vm1, %v4883_v46 }
 0x227   : > { %v4264_v45 = vpop.f32.mrb[0].mxu1 }
 0x228   : > { %v210_v47 = vpop.f32.mrb[1].mxu1  ;;  %v5098_v49 = vadd.f32 %v4264_v45, %v4044_v44 }
 0x229   : > { %v5090_v48 = vadd.f32 %v4044_v44, %v210_v47 }
 0x22b   : > { %225 = vrot.lane.b32.xlu1 %v5090_v48, %s4884_s0  ;;  %221 = vrot.lane.b32.xlu0 %v5090_v48, %s4885_s19 }
 0x22f   : > { %227 = vrot.lane.b32.xlu1 %v5098_v49, %s4884_s0  ;;  %223 = vrot.lane.b32.xlu0 %v5098_v49, %s4885_s19  ;;  %s1733_s0 = scalar_lea.vmem %s5645_s11, %s4861_s3 }
 0x233   : > { %231 = vrot.lane.b32.xlu1 %v5098_v49, %s4887_s1  ;;  %229 = vrot.lane.b32.xlu0 %v5090_v48, %s4887_s1  ;;  %s1728_s1 = scalar_lea.vmem %s5644_s10, %s5074_s24  ;;  %s1850_s24 = scalar_lea.vmem %s5647_s13, %s4861_s3 }
 0x237   : > { %310 = vrot.lane.b32.xlu1 %v5098_v49, %s4888_s20  ;;  %233 = vrot.lane.b32.xlu0 %v5090_v48, %s4888_s20 }
 0x29d   : > { %v5106_v50 = vpop.permute.xlu1 %225  ;;  %v5108_v51 = vpop.permute.xlu0 %221 }
 0x29e   : > { %386 = vrot.lane.b32.xlu0 %v5108_v51, %s4888_s20 }
 0x2a1   : > { %v5111_v52 = vpop.permute.xlu1 %227  ;;  %v5113_v53 = vpop.permute.xlu0 %223 }
 0x2a2   : > { %538 = vrot.lane.b32.xlu0 %v5106_v50, %s4888_s20  ;;  %462 = vrot.lane.b32.xlu1 %v5113_v53, %s4888_s20 }
 0x2a5   : > { %v5117_v54 = vpop.permute.xlu0 %229  ;;  %v5121_v55 = vpop.permute.xlu1 %231 }
 0x2a6   : > { %614 = vrot.lane.b32.xlu1 %v5111_v52, %s4888_s20  ;;  %690 = vrot.lane.b32.xlu0 %v5117_v54, %s4888_s20 }
 0x2a9   : > { %v234_v56 = vpop.permute.xlu0 %233  ;;  %v311_v57 = vpop.permute.xlu1 %310 }
 0x2aa   : > { %766 = vrot.lane.b32.xlu1 %v5121_v55, %s4888_s20  ;;  %4266 = vmatpush3.xpose.msk.msra.mxu1 %vm235_vm2, %v234_v56 }
 0x2ab   : > { %4270 = vmatprep.subr.mxu1 %v4883_v46 }
 0x2ad   : > { %4268 = vmatmul.mubr.msk.f32.vlgmr.msra.gmra.mrb[2].mxu1 %vm235_vm2, %v5090_v48 }
 0x2ae   : > { %4271 = vmatpush3.xpose.msk.msra.mxu1 %vm235_vm2, %v311_v57  ;;  %4272 = vmatprep.mubr.msk.f32.mxu1 %vm4886_vm1, %v4883_v46 }
 0x2af   : > { %4280 = vmatprep.subr.mxu1 %v4883_v46 }
 0x2b1   : > { %4273 = vmatmul.mubr.msk.f32.vlgmr.msra.gmra.mrb[4].mxu1 %vm235_vm2, %v5098_v49 }
 0x2b2   : > { %4282 = vmatprep.mubr.msk.f32.mxu1 %vm4886_vm1, %v4883_v46 }
 0x310   : > { %v387_v58 = vpop.permute.xlu0 %386 }
 0x311   : > { %4276 = vmatpush3.xpose.msk.msra.mxu0 %vm235_vm2, %v387_v58 }
 0x312   : > { %4285 = vmatprep.subr.mxu0 %v4883_v46 }
 0x314   : > { %v463_v59 = vpop.permute.xlu1 %462  ;;  %4278 = vmatmul.mubr.msk.f32.vlgmr.msra.gmra.mrb[0].mxu0 %vm235_vm2, %v5108_v51  ;;  %v539_v60 = vpop.permute.xlu0 %538 }
 0x315   : > { %4281 = vmatpush3.xpose.msk.msra.mxu1 %vm235_vm2, %v463_v59  ;;  %4286 = vmatpush3.xpose.msk.msra.mxu0 %vm235_vm2, %v539_v60 }
 0x316   : > { %4287 = vmatprep.mubr.msk.f32.mxu0 %vm4886_vm1, %v4883_v46  ;;  %4290 = vmatprep.subr.mxu1 %v4883_v46 }
 0x317   : > { %4295 = vmatprep.subr.mxu0 %v4883_v46 }
 0x318   : > { %v615_v61 = vpop.permute.xlu1 %614  ;;  %4283 = vmatmul.mubr.msk.f32.vlgmr.msra.gmra.mrb[6].mxu1 %vm235_vm2, %v5113_v53  ;;  %4288 = vmatmul.mubr.msk.f32.vlgmr.msra.gmra.mrb[2].mxu0 %vm235_vm2, %v5106_v50  ;;  %v691_v62 = vpop.permute.xlu0 %690 }
 0x319   : > { %4291 = vmatpush3.xpose.msk.msra.mxu1 %vm235_vm2, %v615_v61  ;;  %4296 = vmatpush3.xpose.msk.msra.mxu0 %vm235_vm2, %v691_v62 }
 0x31a   : > { %4292 = vmatprep.mubr.msk.f32.mxu1 %vm4886_vm1, %v4883_v46  ;;  %4297 = vmatprep.mubr.msk.f32.mxu0 %vm4886_vm1, %v4883_v46 }
 0x31b   : > { %4300 = vmatprep.subr.mxu1 %v4883_v46  ;;  %4305 = vmatprep.subr.mxu0 %v4883_v46 }
 0x31c   : > { %v767_v63 = vpop.permute.xlu1 %766  ;;  %4293 = vmatmul.mubr.msk.f32.vlgmr.msra.gmra.mrb[8].mxu1 %vm235_vm2, %v5111_v52  ;;  %4298 = vmatmul.mubr.msk.f32.vlgmr.msra.gmra.mrb[4].mxu0 %vm235_vm2, %v5117_v54 }
 0x31d   : > { %4301 = vmatpush3.xpose.msk.msra.mxu1 %vm235_vm2, %v767_v63  ;;  %4302 = vmatprep.mubr.msk.f32.mxu1 %vm4886_vm1, %v4883_v46 }
 0x31e   : > { %4310 = vmatprep.subr.mxu1 %v4883_v46  ;;  %4307 = vmatprep.mubr.msk.f32.mxu0 %vm4886_vm1, %v4883_v46 }
 0x320   : > { %4303 = vmatmul.mubr.msk.f32.vlgmr.msra.gmra.mrb[10].mxu1 %vm235_vm2, %v5121_v55 }
 0x321   : > { %4312 = vmatprep.mubr.msk.f32.mxu1 %vm4886_vm1, %v4883_v46 }
 0x380   : > { %v306_v0 = vpop.f32.mrb[2].mxu1 }
 0x381   : > { %v842_v1 = vmul.f32 0.35355338, %v306_v0  ;;  %v4269_v2 = vpop.f32.mrb[3].mxu1 }
 0x383   : > { %v850_v3 = vadd.f32 %v842_v1, %v5015_v14 }
 0x384   : > { %v382_v4 = vpop.f32.mrb[4].mxu1 }
 0x385   : > { %v843_v5 = vmul.f32 0.35355338, %v382_v4  ;;  %v4274_v6 = vpop.f32.mrb[5].mxu1  ;;  %v858_v7 = vsel %vm235_vm2, %v850_v3, -inf }
 0x386   : > { %859 = vmax.xlane.f32.xlu0 %v858_v7 }
 0x387   : > { %v851_v8 = vadd.f32 %v843_v5, %v5020_v15 }
 0x389   : > { %v861_v9 = vsel %vm235_vm2, %v851_v8, -inf }
 0x38a   : > { %862 = vmax.xlane.f32.xlu1 %v861_v9 }
 0x3e7   : > { %v458_v10 = vpop.f32.mrb[0].mxu0 }
 0x3e8   : > { %v844_v11 = vmul.f32 0.35355338, %v458_v10  ;;  %v4279_v12 = vpop.f32.mrb[1].mxu0 }
 0x3ea   : > { %v852_v13 = vadd.f32 %v844_v11, %v5025_v16 }
 0x3eb   : > { %v534_v22 = vpop.f32.mrb[6].mxu1  ;;  %v610_v23 = vpop.f32.mrb[2].mxu0 }
 0x3ec   : > { %v845_v24 = vmul.f32 0.35355338, %v534_v22  ;;  %v846_v25 = vmul.f32 0.35355338, %v610_v23  ;;  %v4284_v26 = vpop.f32.mrb[7].mxu1  ;;  %v4289_v27 = vpop.f32.mrb[3].mxu0 }
 0x3ed   : > { %v864_v28 = vsel %vm235_vm2, %v852_v13, -inf }
 0x3ee   : > { %v853_v29 = vadd.f32 %v845_v24, %v5030_v17  ;;  %v854_v30 = vadd.f32 %v846_v25, %v5035_v18  ;;  %865 = vmax.xlane.f32.xlu0 %v864_v28 }
 0x3ef   : > { %v686_v31 = vpop.f32.mrb[8].mxu1  ;;  %v762_v32 = vpop.f32.mrb[4].mxu0 }
 0x3f0   : > { %v847_v33 = vmul.f32 0.35355338, %v686_v31  ;;  %v848_v35 = vmul.f32 0.35355338, %v762_v32  ;;  %v4294_v36 = vpop.f32.mrb[9].mxu1  ;;  %v4299_v38 = vpop.f32.mrb[5].mxu0 }
 0x3f1   : > { %v867_v39 = vsel %vm235_vm2, %v853_v29, -inf  ;;  %v870_v40 = vsel %vm235_vm2, %v854_v30, -inf }
 0x3f2   : > { %v855_v41 = vadd.f32 %v847_v33, %v5040_v19  ;;  %v856_v42 = vadd.f32 %v848_v35, %v5045_v20  ;;  %868 = vmax.xlane.f32.xlu0 %v867_v39  ;;  %871 = vmax.xlane.f32.xlu1 %v870_v40 }
 0x3f3   : > { %v838_v43 = vpop.f32.mrb[10].mxu1 }
 0x3f4   : > { %v849_v44 = vmul.f32 0.35355338, %v838_v43  ;;  %v4304_v45 = vpop.f32.mrb[11].mxu1  ;;  %v873_v47 = vsel %vm235_vm2, %v855_v41, -inf  ;;  %v876_v56 = vsel %vm235_vm2, %v856_v42, -inf }
 0x3f6   : > { %v857_v57 = vadd.f32 %v849_v44, %v5050_v21  ;;  %874 = vmax.xlane.f32.xlu0 %v873_v47  ;;  %877 = vmax.xlane.f32.xlu1 %v876_v56 }
 0x3f8   : > { %v879_v58 = vsel %vm235_vm2, %v857_v57, -inf }
 0x3fa   : > { %880 = vmax.xlane.f32.xlu0 %v879_v58 }
 0x407   : > { %946 = vrot.lane.b32.xlu1 %v5090_v48, %s4889_s21 }
 0x40b   : > { %1098 = vrot.lane.b32.xlu1 %v5108_v51, %s4889_s21 }
 0x40f   : > { %1174 = vrot.lane.b32.xlu1 %v5113_v53, %s4889_s21 }
 0x410   : > { %1022 = vrot.lane.b32.xlu0 %v5098_v49, %s4889_s21 }
 0x413   : > { %1326 = vrot.lane.b32.xlu1 %v5111_v52, %s4889_s21  ;;  %v860_v61 = vpop.xlane.xlu0 %859 }
 0x414   : > { %1250 = vrot.lane.b32.xlu0 %v5106_v50, %s4889_s21  ;;  %v882_v62 = vsub.f32 %v850_v3, %v860_v61 }
 0x416   : > { %v890_v63 = vmul.f32 1.442695, %v882_v62 }
 0x417   : > { %v863_v59 = vpop.xlane.xlu1 %862 }
 0x418   : > { %v883_v60 = vsub.f32 %v851_v8, %v863_v59 }
 0x41a   : > { %v892_v48 = vmul.f32 1.442695, %v883_v60 }
 0x41c   : > { %4707 = vpow2.f32 %v892_v48 }
 0x41d   : > { %4709 = vpow2.f32 %v890_v63 }
 0x426   : > { %v5200_v51 = vpop.eup %4707 }
 0x427   : > { %v909_v53 = vsel %vm235_vm2, %v5200_v51, 0.0  ;;  %v5204_v49 = vpop.eup %4709 }
 0x428   : > { %v906_v52 = vsel %vm235_vm2, %v5204_v49, 0.0 }
 0x433   : > { %910 = vadd.xlane.f32.xlu0 %v909_v53 }
 0x437   : > { %907 = vadd.xlane.f32.xlu1 %v906_v52 }
 0x47b   : > { %v866_v50 = vpop.xlane.xlu0 %865 }
 0x47c   : > { %v884_v0 = vsub.f32 %v852_v13, %v866_v50 }
 0x47e   : > { %v894_v1 = vmul.f32 1.442695, %v884_v0 }
 0x47f   : > { %v872_v2 = vpop.xlane.xlu1 %871  ;;  %v869_v3 = vpop.xlane.xlu0 %868 }
 0x480   : > { %4711 = vpow2.f32 %v894_v1  ;;  %v886_v4 = vsub.f32 %v854_v30, %v872_v2  ;;  %v885_v5 = vsub.f32 %v853_v29, %v869_v3 }
 0x482   : > { %v898_v6 = vmul.f32 1.442695, %v886_v4  ;;  %v896_v7 = vmul.f32 1.442695, %v885_v5 }
 0x483   : > { %v878_v8 = vpop.xlane.xlu1 %877  ;;  %v875_v9 = vpop.xlane.xlu0 %874 }
 0x484   : > { %4713 = vpow2.f32 %v898_v6  ;;  %v888_v10 = vsub.f32 %v856_v42, %v878_v8  ;;  %v887_v11 = vsub.f32 %v855_v41, %v875_v9 }
 0x485   : > { %4715 = vpow2.f32 %v896_v7 }
 0x486   : > { %v902_v12 = vmul.f32 1.442695, %v888_v10  ;;  %v900_v22 = vmul.f32 1.442695, %v887_v11 }
 0x487   : > { %v947_v23 = vpop.permute.xlu1 %946  ;;  %v881_v24 = vpop.xlane.xlu0 %880 }
 0x488   : > { %4717 = vpow2.f32 %v902_v12  ;;  %v889_v13 = vsub.f32 %v857_v57, %v881_v24  ;;  %4306 = vmatpush3.msra.mxu0 %v947_v23  ;;  %v1587_v12 = vld [vmem:[%s1586_s23] sm:$0xff]  ;;  %v1589_v24 = vld [vmem:[%s1586_s23 + $0x10] sm:$0xff] }
 0x489   : > { %4719 = vpow2.f32 %v900_v22  ;;  %4315 = vmatprep.subr.mxu0 %v4883_v46  ;;  %v1588_v22 = vld [vmem:[%s1586_s23 + $0x8] sm:$0xff] }
 0x48a   : > { %v4712_v25 = vpop.eup %4711  ;;  %v904_v26 = vmul.f32 1.442695, %v889_v13  ;;  %v4537_v23 = vpack.c.bf16 %v1588_v22, %v1587_v12  ;;  %v1590_v13 = vld [vmem:[%s1586_s23 + $0x18] sm:$0xff]  ;;  %s1684_s23 = scalar_lea.vmem %s5643_s9, %s4861_s3 }
 0x48b   : > { %v1023_v27 = vpop.permute.xlu0 %1022  ;;  %v912_v28 = vsel %vm235_vm2, %v4712_v25, 0.0  ;;  %v1099_v41 = vpop.permute.xlu1 %1098 }
 0x48c   : > { %4721 = vpow2.f32 %v904_v26  ;;  %913 = vadd.xlane.f32.xlu1 %v912_v28  ;;  %4311 = vmatpush3.msra.mxu1 %v1023_v27 }
 0x48d   : > { %4320 = vmatprep.subr.mxu1 %v4883_v46 }
 0x48e   : > { %v4714_v29 = vpop.eup %4713 }
 0x48f   : > { %v4716_v30 = vpop.eup %4715  ;;  %v918_v31 = vsel %vm235_vm2, %v4714_v29, 0.0  ;;  %v1175_v42 = vpop.permute.xlu1 %1174 }
 0x490   : > { %919 = vadd.xlane.f32.xlu1 %v918_v31  ;;  %v915_v32 = vsel %vm235_vm2, %v4716_v30, 0.0  ;;  %v1251_v43 = vpop.permute.xlu0 %1250 }
 0x491   : > { %916 = vadd.xlane.f32.xlu0 %v915_v32 }
 0x492   : > { %v4718_v33 = vpop.eup %4717 }
 0x493   : > { %v4720_v35 = vpop.eup %4719  ;;  %v924_v36 = vsel %vm235_vm2, %v4718_v33, 0.0  ;;  %v1327_v44 = vpop.permute.xlu1 %1326 }
 0x494   : > { %925 = vadd.xlane.f32.xlu1 %v924_v36  ;;  %v921_v38 = vsel %vm235_vm2, %v4720_v35, 0.0 }
 0x495   : > { %922 = vadd.xlane.f32.xlu0 %v921_v38 }
 0x496   : > { %v5215_v39 = vpop.eup %4721 }
 0x497   : > { %v927_v40 = vsel %vm235_vm2, %v5215_v39, 0.0 }
 0x499   : > { %928 = vadd.xlane.f32.xlu0 %v927_v40 }
 0x4a5   : > { %1478 = vrot.lane.b32.xlu1 %v5121_v55, %s4889_s21 }
 0x4af   : > { %1402 = vrot.lane.b32.xlu0 %v5117_v54, %s4889_s21  ;;  %s1682_s21 = scalar_lea.vmem %s5642_s8, %s4861_s3 }
 0x4c0   : > { %v911_v45 = vpop.xlane.xlu0 %910 }
 0x4c1   : > { %4723 = vrcp.f32 %v911_v45 }
 0x4c4   : > { %v908_v47 = vpop.xlane.xlu1 %907 }
 0x4c5   : > { %4725 = vrcp.f32 %v908_v47 }
 0x4cb   : > { %v4724_v56 = vpop.eup %4723 }
 0x4cc   : > { %v933_v57 = vmul.f32 %v4724_v56, %v5200_v51 }
 0x4ce   : > { %4313 = vmatmul.mubr.msk.f32.vlgmr.msra.gmra.mrb[12].mxu1 %vm235_vm2, %v933_v57 }
 0x4cf   : > { %v4726_v58 = vpop.eup %4725  ;;  %4321 = vmatpush3.msra.mxu1 %v1175_v42  ;;  %4322 = vmatprep.mubr.msk.f32.mxu1 %vm4886_vm1, %v4883_v46 }
 0x4d0   : > { %v931_v54 = vmul.f32 %v4726_v58, %v5204_v49  ;;  %4330 = vmatprep.subr.mxu1 %v4883_v46 }
 0x4d2   : > { %4308 = vmatmul.mubr.msk.f32.vlgmr.msra.gmra.mrb[6].mxu0 %vm235_vm2, %v931_v54 }
 0x4d3   : > { %4316 = vmatpush3.msra.mxu0 %v1099_v41  ;;  %4317 = vmatprep.mubr.msk.f32.mxu0 %vm4886_vm1, %v4883_v46 }
 0x4d4   : > { %4325 = vmatprep.subr.mxu0 %v4883_v46 }
 0x519   : > { %v914_v55 = vpop.xlane.xlu1 %913 }
 0x51a   : > { %4727 = vrcp.f32 %v914_v55  ;;  %v4071_v55 = vld [vmem:[%s1591_s30] ss:$0 sm:$0xff] }
 0x51d   : > { %v920_v59 = vpop.xlane.xlu1 %919 }
 0x51e   : > { %4729 = vrcp.f32 %v920_v59  ;;  %v917_v60 = vpop.xlane.xlu0 %916 }
 0x51f   : > { %4731 = vrcp.f32 %v917_v60 }
 0x521   : > { %v926_v61 = vpop.xlane.xlu1 %925 }
 0x522   : > { %4733 = vrcp.f32 %v926_v61  ;;  %v923_v62 = vpop.xlane.xlu0 %922 }
 0x523   : > { %4735 = vrcp.f32 %v923_v62 }
 0x524   : > { %v4728_v48 = vpop.eup %4727 }
 0x525   : > { %v935_v63 = vmul.f32 %v4728_v48, %v4712_v25  ;;  %v1479_v5 = vpop.permute.xlu1 %1478 }
 0x526   : > { %v929_v51 = vpop.xlane.xlu0 %928 }
 0x527   : > { %4737 = vrcp.f32 %v929_v51  ;;  %4318 = vmatmul.mubr.msk.f32.vlgmr.msra.gmra.mrb[8].mxu0 %vm235_vm2, %v935_v63 }
 0x528   : > { %v4730_v53 = vpop.eup %4729  ;;  %4326 = vmatpush3.msra.mxu0 %v1251_v43  ;;  %4327 = vmatprep.mubr.msk.f32.mxu0 %vm4886_vm1, %v4883_v46 }
 0x529   : > { %v4732_v49 = vpop.eup %4731  ;;  %v939_v52 = vmul.f32 %v4730_v53, %v4714_v29  ;;  %4335 = vmatprep.subr.mxu0 %v4883_v46 }
 0x52a   : > { %v937_v50 = vmul.f32 %v4732_v49, %v4716_v30  ;;  %v1403_v0 = vpop.permute.xlu0 %1402 }
 0x52b   : > { %4328 = vmatmul.mubr.msk.f32.vlgmr.msra.gmra.mrb[10].mxu0 %vm235_vm2, %v939_v52 }
 0x52c   : > { %v4734_v1 = vpop.eup %4733  ;;  %4323 = vmatmul.mubr.msk.f32.vlgmr.msra.gmra.mrb[14].mxu1 %vm235_vm2, %v937_v50  ;;  %4336 = vmatpush3.msra.mxu0 %v1403_v0 }
 0x52d   : > { %v4736_v2 = vpop.eup %4735  ;;  %v943_v3 = vmul.f32 %v4734_v1, %v4718_v33  ;;  %4331 = vmatpush3.msra.mxu1 %v1327_v44  ;;  %4332 = vmatprep.mubr.msk.f32.mxu1 %vm4886_vm1, %v4883_v46 }
 0x52e   : > { %v941_v4 = vmul.f32 %v4736_v2, %v4720_v35  ;;  %4337 = vmatprep.mubr.msk.f32.mxu0 %vm4886_vm1, %v4883_v46  ;;  %4340 = vmatprep.subr.mxu1 %v4883_v46 }
 0x52f   : > { %4338 = vmatmul.mubr.msk.f32.vlgmr.msra.gmra.mrb[12].mxu0 %vm235_vm2, %v943_v3  ;;  %4538 = vmatprep.subr.bf16.mxu0 %v4537_v23 }
 0x530   : > { %4333 = vmatmul.mubr.msk.f32.vlgmr.msra.gmra.mrb[16].mxu1 %vm235_vm2, %v941_v4  ;;  %4540 = vmatpush3.bf16.msra.mxu0 %v4537_v23 }
 0x531   : > { %v4738_v6 = vpop.eup %4737  ;;  %4341 = vmatpush3.msra.mxu1 %v1479_v5  ;;  %4342 = vmatprep.mubr.msk.f32.mxu1 %vm4886_vm1, %v4883_v46  ;;  %v4541_v46 = vpack.c.bf16 %v1590_v13, %v1589_v24 }
 0x532   : > { %v945_v7 = vmul.f32 %v4738_v6, %v5215_v39  ;;  %v1730_v6 = vld [vmem:[%s1728_s1 + $0x8] sm:$0xff] }
 0x533   : > { %4542 = vmatprep.subr.bf16.mxu0 %v4541_v46 }
 0x534   : > { %4343 = vmatmul.mubr.msk.f32.vlgmr.msra.gmra.mrb[18].mxu1 %vm235_vm2, %v945_v7  ;;  %4544 = vmatpush3.bf16.msra.mxu0 %v4541_v46  ;;  %v1731_v7 = vld [vmem:[%s1728_s1 + $0x10] sm:$0xff] }
 0x5a1   : > { %v1094_v8 = vpop.f32.mrb[12].mxu1 }
 0x5a2   : > { %v4314_v9 = vpop.f32.mrb[13].mxu1 }
 0x5a3   : > { %v1732_v9 = vld [vmem:[%s1728_s1 + $0x18] sm:$0xff] }
 0x5a5   : > { %v1018_v10 = vpop.f32.mrb[6].mxu0 }
 0x5a6   : > { %v4309_v11 = vpop.f32.mrb[7].mxu0 }
 0x5fa   : > { %v1170_v25 = vpop.f32.mrb[8].mxu0 }
 0x5fb   : > { %v4319_v26 = vpop.f32.mrb[9].mxu0  ;;  %1556 = vrot.lane.b32.xlu0 %v1170_v25, %s4890_s25  ;;  %v4074_v25 = vld [vmem:[%s1682_s21] ss:$0 sm:$0xff] }
 0x5fe   : > { %v1322_v27 = vpop.f32.mrb[10].mxu0 }
 0x5ff   : > { %v1246_v28 = vpop.f32.mrb[14].mxu1  ;;  %1564 = vrot.lane.b32.xlu0 %v1322_v27, %s4891_s26  ;;  %v4329_v29 = vpop.f32.mrb[11].mxu0  ;;  %v4075_v27 = vld [vmem:[%s1684_s23] ss:$0 sm:$0xff] }
 0x600   : > { %1558 = vrot.lane.b32.xlu1 %v1246_v28, %s4890_s25  ;;  %v4324_v30 = vpop.f32.mrb[15].mxu1  ;;  %s4079_s25 = sshll.u32 %s4861_s3, 6 }
 0x601   : > { %s1841_s28 = scalar_lea.vmem %s5646_s12, %s4079_s25  ;;  %s1944_s25 = scalar_lea.vmem %s5649_s15, %s4861_s3 }
 0x602   : > { %v1474_v31 = vpop.f32.mrb[12].mxu0  ;;  %s121_s3 = sadd.s32 1, %s4861_s3  }
 0x603   : > { %v1398_v32 = vpop.f32.mrb[16].mxu1  ;;  %1572 = vrot.lane.b32.xlu0 %v1474_v31, %s4892_s27  ;;  %v4339_v33 = vpop.f32.mrb[13].mxu0  ;;  %p118_p0 = scmp.ge.s32.totalorder %s121_s3, 8  }
 0x604   : > { %1566 = vrot.lane.b32.xlu1 %v1398_v32, %s4891_s26  ;;  %v4334_v35 = vpop.f32.mrb[17].mxu1  ;;  %s5331_s26 = smov (%p118_p0), 8  }
 0x605   : > { %v1842_v35 = vld [vmem:[%s1841_s28] sm:$0xff] }
 0x607   : > { %v1550_v36 = vpop.f32.mrb[18].mxu1 }
 0x608   : > { %1574 = vrot.lane.b32.xlu1 %v1550_v36, %s4892_s27  ;;  %v4344_v38 = vpop.f32.mrb[19].mxu1  ;;  %v1843_v36 = vld [vmem:[%s1841_s28 + $0x8] sm:$0xff] }
 0x609   : > { %v4553_v38 = vpack.c.bf16 %v1843_v36, %v1842_v35 }
 0x60b   : > { %4554 = vmatprep.subr.bf16.mxu0 %v4553_v38 }
 0x66d   : > { %v1557_v39 = vpop.permute.xlu0 %1556 }
 0x66e   : > { %v1578_v42 = vsel %vm235_vm2, %v1018_v10, %v1557_v39  ;;  %v4549_v10 = vpack.c.bf16 %v1732_v9, %v1731_v7  ;;  %v1844_v39 = vld [vmem:[%s1841_s28 + $0x10] sm:$0xff] }
 0x671   : > { %v1565_v40 = vpop.permute.xlu0 %1564 }
 0x672   : > { %v1559_v41 = vpop.permute.xlu1 %1558  ;;  %v1581_v43 = vsel %vm1580_vm3, %v1578_v42, %v1565_v40  ;;  %v1845_v40 = vld [vmem:[%s1841_s28 + $0x18] sm:$0xff]  ;;  %v1846_v42 = vld [vmem:[%s1841_s28 + $0x20] sm:$0xff] }
 0x673   : > { %v1579_v56 = vsel %vm235_vm2, %v1094_v8, %v1559_v41  ;;  %v4557_v41 = vpack.c.bf16 %v1845_v40, %v1844_v39 }
 0x675   : > { %v1573_v44 = vpop.permute.xlu0 %1572 }
 0x676   : > { %v1567_v45 = vpop.permute.xlu1 %1566  ;;  %v1584_v47 = vsel %vm1583_vm4, %v1581_v43, %v1573_v44  ;;  %v1847_v43 = vld [vmem:[%s1841_s28 + $0x28] sm:$0xff] }
 0x677   : > { %4353 = vmatprep.mubr.msk.f32.mxu0 %vm72_vm0, %v1584_v47  ;;  %v1582_v57 = vsel %vm1580_vm3, %v1579_v56, %v1567_v45  ;;  %v4561_v44 = vpack.c.bf16 %v1847_v43, %v1846_v42  ;;  %v1848_v45 = vld [vmem:[%s1841_s28 + $0x30] sm:$0xff]  ;;  %v1849_v47 = vld [vmem:[%s1841_s28 + $0x38] sm:$0xff] }
 0x678   : > { %v4565_v56 = vpack.c.bf16 %v1849_v47, %v1848_v45 }
 0x67a   : > { %v1575_v58 = vpop.permute.xlu1 %1574 }
 0x67b   : > { %v1585_v54 = vsel %vm1583_vm4, %v1582_v57, %v1575_v58  ;;  %v4076_v57 = vld [vmem:[%s1733_s0] ss:$0 sm:$0xff] }
 0x67c   : > { %4354 = vmatmul.mubr.msk.f32.vlgmr.msra.gmra.mrb[14].mxu0 %vm72_vm0, %v1585_v54 }
 0x67d   : > { %4556 = vmatpush3.bf16.msra.mxu0 %v4553_v38 }
 0x67e   : > { %4558 = vmatprep.subr.bf16.mxu0 %v4557_v41 }
 0x681   : > { %4560 = vmatpush3.bf16.msra.mxu0 %v4557_v41  ;;  %v4083_v41 = vld [vmem:[%s1942_s22] ss:$0 sm:$0xff] }
 0x682   : > { %4562 = vmatprep.subr.bf16.mxu0 %v4561_v44 }
 0x685   : > { %4564 = vmatpush3.bf16.msra.mxu0 %v4561_v44  ;;  %v4084_v44 = vld [vmem:[%s1944_s25] ss:$0 sm:$0xff] }
 0x686   : > { %4566 = vmatprep.subr.bf16.mxu0 %v4565_v56 }
 0x689   : > { %4568 = vmatpush3.bf16.msra.mxu0 %v4565_v56 }
 0x74f   : > { %v4355_v59 = vpop.f32.mrb[14].mxu0 }
 0x750   : > { %v1677_v60 = vadd.f32 %v4355_v59, %v4071_v55  ;;  %v1671_v61 = vpop.f32.mrb[15].mxu0 }
 0x751   : > { %v1672_v62 = vadd.f32 %v4071_v55, %v1671_v61 }
 0x752   : > { %v1681_v48 = vadd.f32 %v4853_v37, %v1677_v60  ;;  %v1729_v37 = vld [vmem:[%s1728_s1] sm:$0xff] }
 0x753   : > { %v1680_v63 = vadd.f32 %v4857_v34, %v1672_v62  ;;  %v4545_v8 = vpack.c.bf16 %v1730_v6, %v1729_v37  ;;  %v4080_v6 = vld [vmem:[%s1850_s24] ss:$0 sm:$0xff] }
 0x754   : > { %v1689_v51 = vsel %vm72_vm0, %v1681_v48, 0.0 }
 0x755   : > { %1690 = vadd.xlane.f32.xlu1 %v1689_v51  ;;  %v1686_v53 = vsel %vm72_vm0, %v1680_v63, 0.0  ;;  %4546 = vmatprep.subr.bf16.mxu1 %v4545_v8 }
 0x756   : > { %1687 = vadd.xlane.f32.xlu0 %v1686_v53  ;;  %4548 = vmatpush3.bf16.msra.mxu1 %v4545_v8 }
 0x757   : > { %4550 = vmatprep.subr.bf16.mxu1 %v4549_v10 }
 0x75a   : > { %4552 = vmatpush3.bf16.msra.mxu1 %v4549_v10 }
 0x7e2   : > { %v1691_v49 = vpop.xlane.xlu1 %1690 }
 0x7e3   : > { %v1693_v52 = vmul.f32 0.03125, %v1691_v49  ;;  %v1688_v50 = vpop.xlane.xlu0 %1687 }
 0x7e4   : > { %v1692_v0 = vmul.f32 0.03125, %v1688_v50 }
 0x7e5   : > { %v1695_v1 = vsub.f32 %v1681_v48, %v1693_v52 }
 0x7e6   : > { %v1694_v2 = vsub.f32 %v1680_v63, %v1692_v0 }
 0x7e7   : > { %v1697_v5 = vmul.f32 %v1695_v1, %v1695_v1 }
 0x7e8   : > { %v1696_v3 = vmul.f32 %v1694_v2, %v1694_v2 }
 0x7e9   : > { %v1701_v34 = vsel %vm72_vm0, %v1697_v5, 0.0 }
 0x7ea   : > { %v1698_v4 = vsel %vm72_vm0, %v1696_v3, 0.0 }
 0x7eb   : > { %1699 = vadd.xlane.f32.xlu0 %v1698_v4 }
 0x7ef   : > { %1702 = vadd.xlane.f32.xlu0 %v1701_v34 }
 0x878   : > { %v1700_v11 = vpop.xlane.xlu0 %1699 }
 0x879   : > { %v1704_v12 = vmul.f32 0.03125, %v1700_v11 }
 0x87b   : > { %v1706_v22 = vadd.f32 1e-12, %v1704_v12 }
 0x87c   : > { %v1703_v23 = vpop.xlane.xlu0 %1702 }
 0x87d   : > { %4739 = vrsqrt.f32 %v1706_v22  ;;  %v1705_v24 = vmul.f32 0.03125, %v1703_v23 }
 0x87f   : > { %v1707_v13 = vadd.f32 1e-12, %v1705_v24 }
 0x881   : > { %4741 = vrsqrt.f32 %v1707_v13 }
 0x887   : > { %v4740_v46 = vpop.eup %4739 }
 0x888   : > { %v1710_v26 = vmul.f32 %v4740_v46, %v1694_v2 }
 0x88a   : > { %v1718_v28 = vmul.f32 %v4074_v25, %v1710_v26 }
 0x88b   : > { %v4742_v29 = vpop.eup %4741 }
 0x88c   : > { %v1711_v30 = vmul.f32 %v4742_v29, %v1695_v1  ;;  %v5284_v31 = vadd.f32 %v4075_v27, %v1718_v28 }
 0x88e   : > { %v1719_v32 = vmul.f32 %v4074_v25, %v1711_v30  ;;  %4364 = vmatprep.mubr.msk.f32.mxu1 %vm72_vm0, %v5284_v31 }
 0x890   : > { %v1727_v33 = vadd.f32 %v4075_v27, %v1719_v32 }
 0x892   : > { %4365 = vmatmul.mubr.msk.f32.vlgmr.msra.gmra.mrb[20].mxu1 %vm72_vm0, %v1727_v33 }
 0x965   : > { %v4366_v58 = vpop.f32.mrb[20].mxu1 }
 0x966   : > { %v1819_v54 = vadd.f32 %v4366_v58, %v4076_v57  ;;  %v1813_v55 = vpop.f32.mrb[21].mxu1 }
 0x967   : > { %v1814_v59 = vadd.f32 %v4076_v57, %v1813_v55  ;;  %v5325_v55 = vmov (%p118_p0), -inf  }
 0x968   : > { %v1825_v60 = vmul.f32 0.044715, %v1819_v54  ;;  %v1823_v5 = vmul.f32 0.5, %v1819_v54 }
 0x969   : > { %v1824_v61 = vmul.f32 0.044715, %v1814_v59  ;;  %v1822_v3 = vmul.f32 0.5, %v1814_v59 }
 0x96a   : > { %v1827_v62 = vmul.f32 %v1825_v60, %v1819_v54 }
 0x96b   : > { %v1826_v48 = vmul.f32 %v1824_v61, %v1814_v59 }
 0x96c   : > { %v1829_v63 = vmul.f32 %v1827_v62, %v1819_v54 }
 0x96d   : > { %v1828_v51 = vmul.f32 %v1826_v48, %v1814_v59 }
 0x96e   : > { %v1831_v53 = vadd.f32 %v1829_v63, %v1819_v54  ;;  %v5323_v54 = vmov (%p118_p0), -inf  }
 0x96f   : > { %v1830_v49 = vadd.f32 %v1828_v51, %v1814_v59 }
 0x970   : > { %v1833_v52 = vmul.f32 0.7978846, %v1831_v53 }
 0x971   : > { %v1832_v50 = vmul.f32 0.7978846, %v1830_v49 }
 0x972   : > { %4743 = vtanh.f32 %v1833_v52 }
 0x973   : > { %4745 = vtanh.f32 %v1832_v50 }
 0x97c   : > { %v4744_v0 = vpop.eup %4743 }
 0x97d   : > { %v4746_v1 = vpop.eup %4745  ;;  %v1837_v2 = vadd.f32 1.0, %v4744_v0 }
 0x97e   : > { %v1836_v4 = vadd.f32 1.0, %v4746_v1 }
 0x97f   : > { %v1839_v37 = vmul.f32 %v1837_v2, %v1823_v5 }
 0x980   : > { %v1838_v34 = vmul.f32 %v1836_v4, %v1822_v3 }
 0x982   : > { %4383 = vmatprep.mubr.msk.f32.mxu0 %vm1858_vm5, %v1838_v34 }
 0x983   : > { %4384 = vmatmul.mubr.msk.f32.vlgmr.msra.gmra.mrb[16].mxu0 %vm1858_vm5, %v1839_v37 }
 0xa56   : > { %v4385_v7 = vpop.f32.mrb[16].mxu0 }
 0xa57   : > { %v1937_v8 = vadd.f32 %v4385_v7, %v4080_v6  ;;  %v1931_v9 = vpop.f32.mrb[17].mxu0 }
 0xa58   : > { %v1932_v10 = vadd.f32 %v4080_v6, %v1931_v9 }
 0xa59   : > { %v1941_v11 = vadd.f32 %v1937_v8, %v1727_v33 }
 0xa5a   : > { %v1940_v12 = vadd.f32 %v1932_v10, %v5284_v31 }
 0xa5b   : > { %v1949_v22 = vsel %vm72_vm0, %v1941_v11, 0.0 }
 0xa5c   : > { %1950 = vadd.xlane.f32.xlu0 %v1949_v22  ;;  %v1946_v23 = vsel %vm72_vm0, %v1940_v12, 0.0 }
 0xa5d   : > { %1947 = vadd.xlane.f32.xlu1 %v1946_v23 }
 0xae9   : > { %v1951_v24 = vpop.xlane.xlu0 %1950 }
 0xaea   : > { %v1953_v13 = vmul.f32 0.03125, %v1951_v24  ;;  %v1948_v46 = vpop.xlane.xlu1 %1947 }
 0xaeb   : > { %v1952_v25 = vmul.f32 0.03125, %v1948_v46 }
 0xaec   : > { %v1955_v26 = vsub.f32 %v1941_v11, %v1953_v13 }
 0xaed   : > { %v1954_v27 = vsub.f32 %v1940_v12, %v1952_v25 }
 0xaee   : > { %v1957_v28 = vmul.f32 %v1955_v26, %v1955_v26 }
 0xaef   : > { %v1956_v29 = vmul.f32 %v1954_v27, %v1954_v27 }
 0xaf0   : > { %v1961_v30 = vsel %vm72_vm0, %v1957_v28, 0.0 }
 0xaf1   : > { %1962 = vadd.xlane.f32.xlu0 %v1961_v30  ;;  %v1958_v31 = vsel %vm72_vm0, %v1956_v29, 0.0 }
 0xaf2   : > { %1959 = vadd.xlane.f32.xlu1 %v1958_v31 }
 0xb7e   : > { %v1963_v32 = vpop.xlane.xlu0 %1962 }
 0xb7f   : > { %v1965_v33 = vmul.f32 0.03125, %v1963_v32  ;;  %v1960_v35 = vpop.xlane.xlu1 %1959 }
 0xb80   : > { %v1964_v36 = vmul.f32 0.03125, %v1960_v35 }
 0xb81   : > { %v1967_v38 = vadd.f32 1e-12, %v1965_v33 }
 0xb82   : > { %v1966_v39 = vadd.f32 1e-12, %v1964_v36 }
 0xb83   : > { %4747 = vrsqrt.f32 %v1967_v38 }
 0xb84   : > { %4749 = vrsqrt.f32 %v1966_v39 }
 0xb8d   : > { %v4748_v40 = vpop.eup %4747 }
 0xb8e   : > { %v4750_v42 = vpop.eup %4749  ;;  %v1971_v43 = vmul.f32 %v4748_v40, %v1955_v26 }
 0xb8f   : > { %v1970_v45 = vmul.f32 %v4750_v42, %v1954_v27  ;;  %120 = sbr.rel (!%p118_p0) target bundleno = 327 (0x147), region = 130 }
 0xb90   : > { %v1979_v47 = vmul.f32 %v4083_v41, %v1971_v43 }
 0xb91   : > { %v1978_v56 = vmul.f32 %v4083_v41, %v1970_v45 }
 0xb92   : > { %v1987_v57 = vadd.f32 %v4084_v44, %v1979_v47  }
 0xb93   : > { %v1986_v58 = vadd.f32 %v4084_v44, %v1978_v56  }
 0xb94   : > { %v5660_v37 = vmov %v1987_v57 }
 0xb95   : > { %v5661_v34 = vmov %v1986_v58 }
 0xb96 LB: > { %s5349_s3 = sshll.u32 %s4881_s26, 5  ;;  %4394 = vmatprep.mubr.msk.f32.mxu1 %vm72_vm0, %v4877_v58  ;;  %s2004_s19 = scalar_lea.vmem %s5639_s5, %s4881_s26  ;;  %v4893_v49 = vmov 0.0   ;;  %vm4896_vm6 = vmmov 0   ;;  %s4881_s26 = sphi %s5331_s26, %s1993_s26   ;;  %v4877_v58 = vphi %v1986_v58, %v3860_v58   ;;  %v4873_v57 = vphi %v1987_v57, %v3861_v57   ;;  %v4869_v55 = vphi %v5325_v55, %v5663_v55   ;;  %v4865_v54 = vphi %v5323_v54, %v5662_v54  }
 0xb97   : > { %s1999_s29 = scalar_lea.vmem %s5638_s4, %s5349_s3  ;;  %v4086_v51 = vld [vmem:[%s2004_s19] ss:$0 sm:$0xff]  ;;  %4407 = vmatprep.subr.mxu0 %v4893_v49  ;;  %s4894_s1 = smov 112   ;;  %4409 = vmatprep.mubr.msk.f32.mxu0 %vm4896_vm6, %v4893_v49 }
 0xb98   : > { %v2000_v59 = vld [vmem:[%s1999_s29] sm:$0xff]  ;;  %v2001_v60 = vld [vmem:[%s1999_s29 + $0x8] sm:$0xff]  ;;  %v2002_v61 = vld [vmem:[%s1999_s29 + $0x10] sm:$0xff]  ;;  %s4895_s24 = smov 120   ;;  %s4897_s20 = smov 104  }
 0xb99   : > { %v4569_v62 = vpack.c.bf16 %v2001_v60, %v2000_v59  ;;  %v2003_v48 = vld [vmem:[%s1999_s29 + $0x18] sm:$0xff]  ;;  %s4898_s21 = smov 96   ;;  %s4899_s22 = smov 64  }
 0xb9a   : > { %v4573_v63 = vpack.c.bf16 %v2003_v48, %v2002_v61  ;;  %s3460_s25 = scalar_lea.vmem %s5640_s6, %s5349_s3  ;;  %s4900_s27 = smov 8  }
 0xb9b   : > { %4570 = vmatprep.subr.bf16.mxu1 %v4569_v62  ;;  %s4901_s28 = smov 16   ;;  %s4902_s29 = smov 24  }
 0xb9c   : > { %4572 = vmatpush3.bf16.msra.mxu1 %v4569_v62  ;;  %s3465_s19 = scalar_lea.vmem %s5641_s7, %s4881_s26  ;;  %s3816_s2 = scalar_lea.vmem %s5648_s14, %s4881_s26 }
 0xb9d   : > { %4574 = vmatprep.subr.bf16.mxu1 %v4573_v63 }
 0xba0   : > { %4576 = vmatpush3.bf16.msra.mxu1 %v4573_v63 }
 0xba1   : > { %4397 = vmatprep.subr.mxu1 %v4893_v49 }
 0xba3   : > { %4395 = vmatmul.mubr.msk.f32.vlgmr.msra.gmra.mrb[0].mxu1 %vm72_vm0, %v4873_v57 }
 0xba4   : > { %4399 = vmatprep.mubr.msk.f32.mxu1 %vm4896_vm6, %v4893_v49 }
 0xc76   : > { %v4396_v53 = vpop.f32.mrb[0].mxu1 }
 0xc77   : > { %v2084_v52 = vpop.f32.mrb[1].mxu1  ;;  %v5373_v0 = vadd.f32 %v4396_v53, %v4086_v51 }
 0xc78   : > { %v5365_v50 = vadd.f32 %v4086_v51, %v2084_v52 }
 0xc7a   : > { %2099 = vrot.lane.b32.xlu1 %v5365_v50, %s4894_s1  ;;  %2095 = vrot.lane.b32.xlu0 %v5365_v50, %s4895_s24 }
 0xc7e   : > { %2101 = vrot.lane.b32.xlu1 %v5373_v0, %s4894_s1  ;;  %2097 = vrot.lane.b32.xlu0 %v5373_v0, %s4895_s24  ;;  %s3607_s1 = scalar_lea.vmem %s5645_s11, %s4881_s26 }
 0xc82   : > { %2105 = vrot.lane.b32.xlu1 %v5373_v0, %s4897_s20  ;;  %2103 = vrot.lane.b32.xlu0 %v5365_v50, %s4897_s20  ;;  %s3602_s20 = scalar_lea.vmem %s5644_s10, %s5349_s3  ;;  %s3724_s3 = scalar_lea.vmem %s5647_s13, %s4881_s26 }
 0xc86   : > { %2184 = vrot.lane.b32.xlu1 %v5373_v0, %s4898_s21  ;;  %2107 = vrot.lane.b32.xlu0 %v5365_v50, %s4898_s21 }
 0xcec   : > { %v5381_v1 = vpop.permute.xlu1 %2099  ;;  %v5383_v2 = vpop.permute.xlu0 %2095 }
 0xced   : > { %2260 = vrot.lane.b32.xlu0 %v5383_v2, %s4898_s21 }
 0xcf0   : > { %v5386_v3 = vpop.permute.xlu1 %2101  ;;  %v5388_v4 = vpop.permute.xlu0 %2097 }
 0xcf1   : > { %2412 = vrot.lane.b32.xlu0 %v5381_v1, %s4898_s21  ;;  %2336 = vrot.lane.b32.xlu1 %v5388_v4, %s4898_s21 }
 0xcf4   : > { %v5392_v5 = vpop.permute.xlu0 %2103  ;;  %v5396_v34 = vpop.permute.xlu1 %2105 }
 0xcf5   : > { %2488 = vrot.lane.b32.xlu1 %v5386_v3, %s4898_s21  ;;  %2564 = vrot.lane.b32.xlu0 %v5392_v5, %s4898_s21 }
 0xcf8   : > { %v2108_v37 = vpop.permute.xlu0 %2107  ;;  %v2185_v6 = vpop.permute.xlu1 %2184 }
 0xcf9   : > { %2640 = vrot.lane.b32.xlu1 %v5396_v34, %s4898_s21  ;;  %4398 = vmatpush3.xpose.msk.msra.mxu1 %vm235_vm2, %v2108_v37 }
 0xcfa   : > { %4402 = vmatprep.subr.mxu1 %v4893_v49 }
 0xcfc   : > { %4400 = vmatmul.mubr.msk.f32.vlgmr.msra.gmra.mrb[2].mxu1 %vm235_vm2, %v5365_v50 }
 0xcfd   : > { %4403 = vmatpush3.xpose.msk.msra.mxu1 %vm235_vm2, %v2185_v6  ;;  %4404 = vmatprep.mubr.msk.f32.mxu1 %vm4896_vm6, %v4893_v49 }
 0xcfe   : > { %4412 = vmatprep.subr.mxu1 %v4893_v49 }
 0xd00   : > { %4405 = vmatmul.mubr.msk.f32.vlgmr.msra.gmra.mrb[4].mxu1 %vm235_vm2, %v5373_v0 }
 0xd01   : > { %4414 = vmatprep.mubr.msk.f32.mxu1 %vm4896_vm6, %v4893_v49 }
 0xd5f   : > { %v2261_v7 = vpop.permute.xlu0 %2260 }
 0xd60   : > { %4408 = vmatpush3.xpose.msk.msra.mxu0 %vm235_vm2, %v2261_v7 }
 0xd61   : > { %4417 = vmatprep.subr.mxu0 %v4893_v49 }
 0xd63   : > { %v2337_v8 = vpop.permute.xlu1 %2336  ;;  %4410 = vmatmul.mubr.msk.f32.vlgmr.msra.gmra.mrb[0].mxu0 %vm235_vm2, %v5383_v2  ;;  %v2413_v9 = vpop.permute.xlu0 %2412 }
 0xd64   : > { %4413 = vmatpush3.xpose.msk.msra.mxu1 %vm235_vm2, %v2337_v8  ;;  %4418 = vmatpush3.xpose.msk.msra.mxu0 %vm235_vm2, %v2413_v9 }
 0xd65   : > { %4419 = vmatprep.mubr.msk.f32.mxu0 %vm4896_vm6, %v4893_v49  ;;  %4422 = vmatprep.subr.mxu1 %v4893_v49 }
 0xd66   : > { %4427 = vmatprep.subr.mxu0 %v4893_v49 }
 0xd67   : > { %v2489_v10 = vpop.permute.xlu1 %2488  ;;  %4415 = vmatmul.mubr.msk.f32.vlgmr.msra.gmra.mrb[6].mxu1 %vm235_vm2, %v5388_v4  ;;  %4420 = vmatmul.mubr.msk.f32.vlgmr.msra.gmra.mrb[2].mxu0 %vm235_vm2, %v5381_v1  ;;  %v2565_v11 = vpop.permute.xlu0 %2564 }
 0xd68   : > { %4423 = vmatpush3.xpose.msk.msra.mxu1 %vm235_vm2, %v2489_v10  ;;  %4428 = vmatpush3.xpose.msk.msra.mxu0 %vm235_vm2, %v2565_v11 }
 0xd69   : > { %4424 = vmatprep.mubr.msk.f32.mxu1 %vm4896_vm6, %v4893_v49  ;;  %4429 = vmatprep.mubr.msk.f32.mxu0 %vm4896_vm6, %v4893_v49 }
 0xd6a   : > { %4432 = vmatprep.subr.mxu1 %v4893_v49  ;;  %4437 = vmatprep.subr.mxu0 %v4893_v49 }
 0xd6b   : > { %v2641_v12 = vpop.permute.xlu1 %2640  ;;  %4425 = vmatmul.mubr.msk.f32.vlgmr.msra.gmra.mrb[8].mxu1 %vm235_vm2, %v5386_v3  ;;  %4430 = vmatmul.mubr.msk.f32.vlgmr.msra.gmra.mrb[4].mxu0 %vm235_vm2, %v5392_v5 }
 0xd6c   : > { %4433 = vmatpush3.xpose.msk.msra.mxu1 %vm235_vm2, %v2641_v12  ;;  %4434 = vmatprep.mubr.msk.f32.mxu1 %vm4896_vm6, %v4893_v49 }
 0xd6d   : > { %4442 = vmatprep.subr.mxu1 %v4893_v49  ;;  %4439 = vmatprep.mubr.msk.f32.mxu0 %vm4896_vm6, %v4893_v49 }
 0xd6f   : > { %4435 = vmatmul.mubr.msk.f32.vlgmr.msra.gmra.mrb[10].mxu1 %vm235_vm2, %v5396_v34 }
 0xd70   : > { %4444 = vmatprep.mubr.msk.f32.mxu1 %vm4896_vm6, %v4893_v49 }
 0xdcf   : > { %v2180_v22 = vpop.f32.mrb[2].mxu1 }
 0xdd0   : > { %v2716_v23 = vmul.f32 0.35355338, %v2180_v22  ;;  %v4401_v24 = vpop.f32.mrb[3].mxu1 }
 0xdd2   : > { %v2724_v13 = vadd.f32 %v2716_v23, %v5015_v14 }
 0xdd3   : > { %v2256_v46 = vpop.f32.mrb[4].mxu1 }
 0xdd4   : > { %v2717_v25 = vmul.f32 0.35355338, %v2256_v46  ;;  %v4406_v26 = vpop.f32.mrb[5].mxu1  ;;  %v2732_v27 = vsel %vm235_vm2, %v2724_v13, -inf }
 0xdd5   : > { %2733 = vmax.xlane.f32.xlu0 %v2732_v27 }
 0xdd6   : > { %v2725_v28 = vadd.f32 %v2717_v25, %v5020_v15 }
 0xdd8   : > { %v2735_v29 = vsel %vm235_vm2, %v2725_v28, -inf }
 0xdd9   : > { %2736 = vmax.xlane.f32.xlu1 %v2735_v29 }
 0xe36   : > { %v2332_v30 = vpop.f32.mrb[0].mxu0 }
 0xe37   : > { %v2718_v31 = vmul.f32 0.35355338, %v2332_v30  ;;  %v4411_v32 = vpop.f32.mrb[1].mxu0 }
 0xe39   : > { %v2726_v33 = vadd.f32 %v2718_v31, %v5025_v16 }
 0xe3a   : > { %v2408_v35 = vpop.f32.mrb[6].mxu1  ;;  %v2484_v36 = vpop.f32.mrb[2].mxu0 }
 0xe3b   : > { %v2719_v38 = vmul.f32 0.35355338, %v2408_v35  ;;  %v2720_v39 = vmul.f32 0.35355338, %v2484_v36  ;;  %v4416_v40 = vpop.f32.mrb[7].mxu1  ;;  %v4421_v41 = vpop.f32.mrb[3].mxu0 }
 0xe3c   : > { %v2738_v42 = vsel %vm235_vm2, %v2726_v33, -inf }
 0xe3d   : > { %v2727_v43 = vadd.f32 %v2719_v38, %v5030_v17  ;;  %v2728_v44 = vadd.f32 %v2720_v39, %v5035_v18  ;;  %2739 = vmax.xlane.f32.xlu0 %v2738_v42 }
 0xe3e   : > { %v2560_v45 = vpop.f32.mrb[8].mxu1  ;;  %v2636_v47 = vpop.f32.mrb[4].mxu0 }
 0xe3f   : > { %v2721_v56 = vmul.f32 0.35355338, %v2560_v45  ;;  %v2722_v59 = vmul.f32 0.35355338, %v2636_v47  ;;  %v4426_v60 = vpop.f32.mrb[9].mxu1  ;;  %v4431_v61 = vpop.f32.mrb[5].mxu0 }
 0xe40   : > { %v2741_v62 = vsel %vm235_vm2, %v2727_v43, -inf  ;;  %v2744_v48 = vsel %vm235_vm2, %v2728_v44, -inf }
 0xe41   : > { %v2729_v63 = vadd.f32 %v2721_v56, %v5040_v19  ;;  %v2730_v51 = vadd.f32 %v2722_v59, %v5045_v20  ;;  %2742 = vmax.xlane.f32.xlu0 %v2741_v62  ;;  %2745 = vmax.xlane.f32.xlu1 %v2744_v48 }
 0xe42   : > { %v2712_v53 = vpop.f32.mrb[10].mxu1 }
 0xe43   : > { %v2723_v52 = vmul.f32 0.35355338, %v2712_v53  ;;  %v4436_v37 = vpop.f32.mrb[11].mxu1  ;;  %v2747_v6 = vsel %vm235_vm2, %v2729_v63, -inf  ;;  %v2750_v7 = vsel %vm235_vm2, %v2730_v51, -inf }
 0xe45   : > { %v2731_v8 = vadd.f32 %v2723_v52, %v5050_v21  ;;  %2748 = vmax.xlane.f32.xlu0 %v2747_v6  ;;  %2751 = vmax.xlane.f32.xlu1 %v2750_v7 }
 0xe47   : > { %v2753_v9 = vsel %vm235_vm2, %v2731_v8, -inf }
 0xe49   : > { %2754 = vmax.xlane.f32.xlu0 %v2753_v9 }
 0xe56   : > { %2820 = vrot.lane.b32.xlu1 %v5365_v50, %s4899_s22 }
 0xe5a   : > { %2972 = vrot.lane.b32.xlu1 %v5383_v2, %s4899_s22 }
 0xe5e   : > { %3048 = vrot.lane.b32.xlu1 %v5388_v4, %s4899_s22 }
 0xe5f   : > { %2896 = vrot.lane.b32.xlu0 %v5373_v0, %s4899_s22 }
 0xe62   : > { %3200 = vrot.lane.b32.xlu1 %v5386_v3, %s4899_s22  ;;  %v2734_v12 = vpop.xlane.xlu0 %2733 }
 0xe63   : > { %3124 = vrot.lane.b32.xlu0 %v5381_v1, %s4899_s22  ;;  %v2756_v22 = vsub.f32 %v2724_v13, %v2734_v12 }
 0xe65   : > { %v2764_v23 = vmul.f32 1.442695, %v2756_v22 }
 0xe66   : > { %v2737_v10 = vpop.xlane.xlu1 %2736 }
 0xe67   : > { %v2757_v11 = vsub.f32 %v2725_v28, %v2737_v10 }
 0xe69   : > { %v2766_v50 = vmul.f32 1.442695, %v2757_v11 }
 0xe6b   : > { %4751 = vpow2.f32 %v2766_v50 }
 0xe6c   : > { %4753 = vpow2.f32 %v2764_v23 }
 0xe75   : > { %v5475_v2 = vpop.eup %4751 }
 0xe76   : > { %v2783_v4 = vsel %vm235_vm2, %v5475_v2, 0.0  ;;  %v5479_v0 = vpop.eup %4753 }
 0xe77   : > { %v2780_v3 = vsel %vm235_vm2, %v5479_v0, 0.0 }
 0xe82   : > { %2784 = vadd.xlane.f32.xlu0 %v2783_v4 }
 0xe86   : > { %2781 = vadd.xlane.f32.xlu1 %v2780_v3 }
 0xeca   : > { %v2740_v1 = vpop.xlane.xlu0 %2739 }
 0xecb   : > { %v2758_v24 = vsub.f32 %v2726_v33, %v2740_v1 }
 0xecd   : > { %v2768_v46 = vmul.f32 1.442695, %v2758_v24 }
 0xece   : > { %v2746_v13 = vpop.xlane.xlu1 %2745  ;;  %v2743_v25 = vpop.xlane.xlu0 %2742 }
 0xecf   : > { %4755 = vpow2.f32 %v2768_v46  ;;  %v2760_v26 = vsub.f32 %v2728_v44, %v2746_v13  ;;  %v2759_v27 = vsub.f32 %v2727_v43, %v2743_v25 }
 0xed1   : > { %v2772_v28 = vmul.f32 1.442695, %v2760_v26  ;;  %v2770_v29 = vmul.f32 1.442695, %v2759_v27 }
 0xed2   : > { %v2752_v30 = vpop.xlane.xlu1 %2751  ;;  %v2749_v31 = vpop.xlane.xlu0 %2748 }
 0xed3   : > { %4757 = vpow2.f32 %v2772_v28  ;;  %v2762_v32 = vsub.f32 %v2730_v51, %v2752_v30  ;;  %v2761_v35 = vsub.f32 %v2729_v63, %v2749_v31 }
 0xed4   : > { %4759 = vpow2.f32 %v2770_v29 }
 0xed5   : > { %v2776_v36 = vmul.f32 1.442695, %v2762_v32  ;;  %v2774_v38 = vmul.f32 1.442695, %v2761_v35 }
 0xed6   : > { %v2821_v39 = vpop.permute.xlu1 %2820  ;;  %v2755_v40 = vpop.xlane.xlu0 %2754 }
 0xed7   : > { %4761 = vpow2.f32 %v2776_v36  ;;  %v2763_v33 = vsub.f32 %v2731_v8, %v2755_v40  ;;  %4438 = vmatpush3.msra.mxu0 %v2821_v39  ;;  %v3461_v39 = vld [vmem:[%s3460_s25] sm:$0xff]  ;;  %v3462_v40 = vld [vmem:[%s3460_s25 + $0x8] sm:$0xff] }
 0xed8   : > { %4763 = vpow2.f32 %v2774_v38  ;;  %4447 = vmatprep.subr.mxu0 %v4893_v49 }
 0xed9   : > { %v4756_v41 = vpop.eup %4755  ;;  %v2778_v42 = vmul.f32 1.442695, %v2763_v33  ;;  %v4577_v33 = vpack.c.bf16 %v3462_v40, %v3461_v39 }
 0xeda   : > { %v2897_v43 = vpop.permute.xlu0 %2896  ;;  %v2786_v44 = vsel %vm235_vm2, %v4756_v41, 0.0  ;;  %v2973_v53 = vpop.permute.xlu1 %2972 }
 0xedb   : > { %4765 = vpow2.f32 %v2778_v42  ;;  %2787 = vadd.xlane.f32.xlu1 %v2786_v44  ;;  %4443 = vmatpush3.msra.mxu1 %v2897_v43  ;;  %v3464_v42 = vld [vmem:[%s3460_s25 + $0x18] sm:$0xff] }
 0xedc   : > { %4452 = vmatprep.subr.mxu1 %v4893_v49 }
 0xedd   : > { %v4758_v45 = vpop.eup %4757 }
 0xede   : > { %v4760_v47 = vpop.eup %4759  ;;  %v2792_v56 = vsel %vm235_vm2, %v4758_v45, 0.0  ;;  %v3049_v52 = vpop.permute.xlu1 %3048 }
 0xedf   : > { %2793 = vadd.xlane.f32.xlu1 %v2792_v56  ;;  %v2789_v59 = vsel %vm235_vm2, %v4760_v47, 0.0  ;;  %v3125_v37 = vpop.permute.xlu0 %3124 }
 0xee0   : > { %2790 = vadd.xlane.f32.xlu0 %v2789_v59 }
 0xee1   : > { %v4762_v60 = vpop.eup %4761 }
 0xee2   : > { %v5488_v61 = vpop.eup %4763  ;;  %v2798_v62 = vsel %vm235_vm2, %v4762_v60, 0.0  ;;  %v3201_v6 = vpop.permute.xlu1 %3200 }
 0xee3   : > { %2799 = vadd.xlane.f32.xlu1 %v2798_v62  ;;  %v2795_v48 = vsel %vm235_vm2, %v5488_v61, 0.0 }
 0xee4   : > { %2796 = vadd.xlane.f32.xlu0 %v2795_v48 }
 0xee5   : > { %v5493_v63 = vpop.eup %4765 }
 0xee6   : > { %v2801_v51 = vsel %vm235_vm2, %v5493_v63, 0.0 }
 0xee8   : > { %2802 = vadd.xlane.f32.xlu0 %v2801_v51 }
 0xef4   : > { %3352 = vrot.lane.b32.xlu1 %v5396_v34, %s4899_s22 }
 0xefe   : > { %3276 = vrot.lane.b32.xlu0 %v5392_v5, %s4899_s22  ;;  %s3556_s22 = scalar_lea.vmem %s5642_s8, %s4881_s26 }
 0xf0f   : > { %v2785_v7 = vpop.xlane.xlu0 %2784 }
 0xf10   : > { %4767 = vrcp.f32 %v2785_v7 }
 0xf13   : > { %v2782_v8 = vpop.xlane.xlu1 %2781 }
 0xf14   : > { %4769 = vrcp.f32 %v2782_v8 }
 0xf1a   : > { %v4768_v9 = vpop.eup %4767 }
 0xf1b   : > { %v2807_v10 = vmul.f32 %v4768_v9, %v5475_v2 }
 0xf1d   : > { %4445 = vmatmul.mubr.msk.f32.vlgmr.msra.gmra.mrb[12].mxu1 %vm235_vm2, %v2807_v10 }
 0xf1e   : > { %v4770_v11 = vpop.eup %4769  ;;  %4453 = vmatpush3.msra.mxu1 %v3049_v52  ;;  %4454 = vmatprep.mubr.msk.f32.mxu1 %vm4896_vm6, %v4893_v49 }
 0xf1f   : > { %v2805_v5 = vmul.f32 %v4770_v11, %v5479_v0  ;;  %4462 = vmatprep.subr.mxu1 %v4893_v49 }
 0xf21   : > { %4440 = vmatmul.mubr.msk.f32.vlgmr.msra.gmra.mrb[6].mxu0 %vm235_vm2, %v2805_v5 }
 0xf22   : > { %4448 = vmatpush3.msra.mxu0 %v2973_v53  ;;  %4449 = vmatprep.mubr.msk.f32.mxu0 %vm4896_vm6, %v4893_v49 }
 0xf23   : > { %4457 = vmatprep.subr.mxu0 %v4893_v49 }
 0xf68   : > { %v2788_v34 = vpop.xlane.xlu1 %2787 }
 0xf69   : > { %4771 = vrcp.f32 %v2788_v34 }
 0xf6c   : > { %v2794_v12 = vpop.xlane.xlu1 %2793 }
 0xf6d   : > { %4773 = vrcp.f32 %v2794_v12  ;;  %v2791_v22 = vpop.xlane.xlu0 %2790 }
 0xf6e   : > { %4775 = vrcp.f32 %v2791_v22  ;;  %v4113_v22 = vld [vmem:[%s3465_s19] ss:$0 sm:$0xff] }
 0xf70   : > { %v2800_v50 = vpop.xlane.xlu1 %2799 }
 0xf71   : > { %4777 = vrcp.f32 %v2800_v50  ;;  %v2797_v23 = vpop.xlane.xlu0 %2796 }
 0xf72   : > { %4779 = vrcp.f32 %v2797_v23 }
 0xf73   : > { %v4772_v2 = vpop.eup %4771 }
 0xf74   : > { %v2809_v4 = vmul.f32 %v4772_v2, %v4756_v41  ;;  %v3353_v29 = vpop.permute.xlu1 %3352  ;;  %v3463_v41 = vld [vmem:[%s3460_s25 + $0x10] sm:$0xff]  ;;  %s3558_s25 = scalar_lea.vmem %s5643_s9, %s4881_s26 }
 0xf75   : > { %v2803_v0 = vpop.xlane.xlu0 %2802 }
 0xf76   : > { %4781 = vrcp.f32 %v2803_v0  ;;  %4450 = vmatmul.mubr.msk.f32.vlgmr.msra.gmra.mrb[8].mxu0 %vm235_vm2, %v2809_v4 }
 0xf77   : > { %v4774_v3 = vpop.eup %4773  ;;  %4458 = vmatpush3.msra.mxu0 %v3125_v37  ;;  %4459 = vmatprep.mubr.msk.f32.mxu0 %vm4896_vm6, %v4893_v49 }
 0xf78   : > { %v4776_v1 = vpop.eup %4775  ;;  %4467 = vmatprep.subr.mxu0 %v4893_v49  ;;  %v2813_v24 = vmul.f32 %v4774_v3, %v4758_v45 }
 0xf79   : > { %v3277_v46 = vpop.permute.xlu0 %3276  ;;  %v2811_v13 = vmul.f32 %v4776_v1, %v4760_v47 }
 0xf7a   : > { %4460 = vmatmul.mubr.msk.f32.vlgmr.msra.gmra.mrb[10].mxu0 %vm235_vm2, %v2813_v24 }
 0xf7b   : > { %v4778_v25 = vpop.eup %4777  ;;  %4455 = vmatmul.mubr.msk.f32.vlgmr.msra.gmra.mrb[14].mxu1 %vm235_vm2, %v2811_v13  ;;  %4468 = vmatpush3.msra.mxu0 %v3277_v46 }
 0xf7c   : > { %v4780_v26 = vpop.eup %4779  ;;  %4463 = vmatpush3.msra.mxu1 %v3201_v6  ;;  %4464 = vmatprep.mubr.msk.f32.mxu1 %vm4896_vm6, %v4893_v49  ;;  %v2817_v27 = vmul.f32 %v4778_v25, %v4762_v60 }
 0xf7d   : > { %4469 = vmatprep.mubr.msk.f32.mxu0 %vm4896_vm6, %v4893_v49  ;;  %4472 = vmatprep.subr.mxu1 %v4893_v49  ;;  %v2815_v28 = vmul.f32 %v4780_v26, %v5488_v61 }
 0xf7e   : > { %4470 = vmatmul.mubr.msk.f32.vlgmr.msra.gmra.mrb[12].mxu0 %vm235_vm2, %v2817_v27  ;;  %4578 = vmatprep.subr.bf16.mxu0 %v4577_v33 }
 0xf7f   : > { %4465 = vmatmul.mubr.msk.f32.vlgmr.msra.gmra.mrb[16].mxu1 %vm235_vm2, %v2815_v28  ;;  %4580 = vmatpush3.bf16.msra.mxu0 %v4577_v33 }
 0xf80   : > { %v4782_v30 = vpop.eup %4781  ;;  %4473 = vmatpush3.msra.mxu1 %v3353_v29  ;;  %4474 = vmatprep.mubr.msk.f32.mxu1 %vm4896_vm6, %v4893_v49  ;;  %v4581_v49 = vpack.c.bf16 %v3464_v42, %v3463_v41 }
 0xf81   : > { %v2819_v31 = vmul.f32 %v4782_v30, %v5493_v63 }
 0xf82   : > { %4582 = vmatprep.subr.bf16.mxu0 %v4581_v49 }
 0xf83   : > { %4475 = vmatmul.mubr.msk.f32.vlgmr.msra.gmra.mrb[18].mxu1 %vm235_vm2, %v2819_v31  ;;  %4584 = vmatpush3.bf16.msra.mxu0 %v4581_v49 }
 0xff0   : > { %v2968_v32 = vpop.f32.mrb[12].mxu1 }
 0xff1   : > { %v4446_v35 = vpop.f32.mrb[13].mxu1 }
 0xff2   : > { %v3605_v35 = vld [vmem:[%s3602_s20 + $0x10] sm:$0xff] }
 0xff4   : > { %v2892_v36 = vpop.f32.mrb[6].mxu0 }
 0xff5   : > { %v4441_v38 = vpop.f32.mrb[7].mxu0 }
 0xff6   : > { %v3606_v38 = vld [vmem:[%s3602_s20 + $0x18] sm:$0xff] }
 0xff7   : > { %v4589_v39 = vpack.c.bf16 %v3606_v38, %v3605_v35 }
0x1049   : > { %v3044_v43 = vpop.f32.mrb[8].mxu0 }
0x104a   : > { %v4451_v44 = vpop.f32.mrb[9].mxu0  ;;  %3430 = vrot.lane.b32.xlu0 %v3044_v43, %s4900_s27 }
0x104d   : > { %v3196_v45 = vpop.f32.mrb[10].mxu0 }
0x104e   : > { %v3120_v47 = vpop.f32.mrb[14].mxu1  ;;  %3438 = vrot.lane.b32.xlu0 %v3196_v45, %s4901_s28  ;;  %v4461_v56 = vpop.f32.mrb[11].mxu0  ;;  %v4116_v45 = vld [vmem:[%s3556_s22] ss:$0 sm:$0xff] }
0x104f   : > { %3432 = vrot.lane.b32.xlu1 %v3120_v47, %s4900_s27  ;;  %v4456_v59 = vpop.f32.mrb[15].mxu1  ;;  %v4117_v56 = vld [vmem:[%s3558_s25] ss:$0 sm:$0xff]  ;;  %s4121_s27 = sshll.u32 %s4881_s26, 6 }
0x1050   : > { %s3715_s30 = scalar_lea.vmem %s5646_s12, %s4121_s27  ;;  %s3818_s27 = scalar_lea.vmem %s5649_s15, %s4881_s26 }
0x1051   : > { %v3348_v60 = vpop.f32.mrb[12].mxu0  ;;  %s1993_s26 = sadd.s32 1, %s4881_s26  }
0x1052   : > { %v3272_v61 = vpop.f32.mrb[16].mxu1  ;;  %3446 = vrot.lane.b32.xlu0 %v3348_v60, %s4902_s29  ;;  %v4471_v62 = vpop.f32.mrb[13].mxu0  ;;  %p1990_p1 = scmp.ge.s32.totalorder %s1993_s26, 12  }
0x1053   : > { %3440 = vrot.lane.b32.xlu1 %v3272_v61, %s4901_s28  ;;  %v4466_v48 = vpop.f32.mrb[17].mxu1  ;;  %vm4904_vm7 = vmmov (%p1990_p1), 0   ;;  %v4905_v14 = vmov (%p1990_p1), 0.0   ;;  %vm3891_vm8 = vcmask (%p1990_p1), 1041409   ;;  %v4127_v17 = vld [vmem:[%s5651_s17] ss:$0 sm:$0xff] (%p1990_p1) }
0x1054   :  { %s4906_s6 = smov (%p1990_p1), [#allocation2]   ;;  %vm3965_vm9 = vcmask (%p1990_p1), 58368  }
0x1055   :  { %s3973_s7 = sshll.u32 (%p1990_p1), %s4906_s6, 4  ;;  %s3974_s7 = int_to_ptr.vmem [resolvable:$true] %s3973_s7 }
0x1056   : > { %v3424_v63 = vpop.f32.mrb[18].mxu1  ;;  %s4795_s8 = scalar_lea.vmem (%p1990_p1), %s3974_s7, 32  ;;  %p4800_p3 = scmp.lt.s32.totalorder (%p1990_p1), %s3974_s7, %s3974_s7 }
0x1057   : > { %3448 = vrot.lane.b32.xlu1 %v3424_v63, %s4902_s29  ;;  %v4476_v51 = vpop.f32.mrb[19].mxu1  ;;  %p4796_p2 = scmp.ne.s32.totalorder (%p1990_p1), %s3974_s7, %s4795_s8  ;;  %p4801_p4 = scmp.lt.s32.totalorder (%p1990_p1), %s4795_s8, %s4795_s8 }
0x1058   : > { %v3716_v51 = vld [vmem:[%s3715_s30] sm:$0xff] }
0x1059   :  { %p4802_p5 = por (%p1990_p1), %p4801_p4, %p4800_p3 }
0x105b   :  { %p4803_p6 = pnand (%p1990_p1), %p4802_p5, %p4796_p2 }
0x10bc   : > { %v3431_v53 = vpop.permute.xlu0 %3430 }
0x10bd   : > { %v3452_v6 = vsel %vm235_vm2, %v2892_v36, %v3431_v53  ;;  %v3717_v53 = vld [vmem:[%s3715_s30 + $0x8] sm:$0xff] }
0x10c0   : > { %v3439_v52 = vpop.permute.xlu0 %3438 }
0x10c1   : > { %v3433_v37 = vpop.permute.xlu1 %3432  ;;  %v3455_v7 = vsel %vm1580_vm3, %v3452_v6, %v3439_v52  ;;  %v3718_v52 = vld [vmem:[%s3715_s30 + $0x10] sm:$0xff]  ;;  %v3719_v6 = vld [vmem:[%s3715_s30 + $0x18] sm:$0xff] }
0x10c2   : > { %v3453_v11 = vsel %vm235_vm2, %v2968_v32, %v3433_v37  ;;  %v3604_v32 = vld [vmem:[%s3602_s20 + $0x8] sm:$0xff]  ;;  %v4593_v37 = vpack.c.bf16 %v3717_v53, %v3716_v51 }
0x10c4   : > { %v3447_v8 = vpop.permute.xlu0 %3446  ;;  %4594 = vmatprep.subr.bf16.mxu0 %v4593_v37 }
0x10c5   : > { %v3441_v9 = vpop.permute.xlu1 %3440  ;;  %v3458_v10 = vsel %vm1583_vm4, %v3455_v7, %v3447_v8  ;;  %v4597_v7 = vpack.c.bf16 %v3719_v6, %v3718_v52  ;;  %v3720_v8 = vld [vmem:[%s3715_s30 + $0x20] sm:$0xff] }
0x10c6   : > { %4485 = vmatprep.mubr.msk.f32.mxu0 %vm72_vm0, %v3458_v10  ;;  %v3456_v5 = vsel %vm1580_vm3, %v3453_v11, %v3441_v9  ;;  %v3721_v9 = vld [vmem:[%s3715_s30 + $0x28] sm:$0xff]  ;;  %v3722_v11 = vld [vmem:[%s3715_s30 + $0x30] sm:$0xff] }
0x10c7   : > { %v4601_v10 = vpack.c.bf16 %v3721_v9, %v3720_v8  ;;  %v4125_v9 = vld [vmem:[%s3816_s2] ss:$0 sm:$0xff] }
0x10c9   : > { %v3449_v34 = vpop.permute.xlu1 %3448 }
0x10ca   : > { %v3459_v12 = vsel %vm1583_vm4, %v3456_v5, %v3449_v34  ;;  %v3723_v5 = vld [vmem:[%s3715_s30 + $0x38] sm:$0xff] }
0x10cb   : > { %4486 = vmatmul.mubr.msk.f32.vlgmr.msra.gmra.mrb[14].mxu0 %vm72_vm0, %v3459_v12  ;;  %v4605_v34 = vpack.c.bf16 %v3723_v5, %v3722_v11  ;;  %v4118_v12 = vld [vmem:[%s3607_s1] ss:$0 sm:$0xff] }
0x10cc   : > { %4596 = vmatpush3.bf16.msra.mxu0 %v4593_v37  ;;  %v4126_v5 = vld [vmem:[%s3818_s27] ss:$0 sm:$0xff] }
0x10cd   : > { %4598 = vmatprep.subr.bf16.mxu0 %v4597_v7 }
0x10d0   : > { %4600 = vmatpush3.bf16.msra.mxu0 %v4597_v7 }
0x10d1   : > { %4602 = vmatprep.subr.bf16.mxu0 %v4601_v10 }
0x10d4   : > { %4604 = vmatpush3.bf16.msra.mxu0 %v4601_v10 }
0x10d5   : > { %4606 = vmatprep.subr.bf16.mxu0 %v4605_v34 }
0x10d8   : > { %4608 = vmatpush3.bf16.msra.mxu0 %v4605_v34 }
0x119e   : > { %v4487_v50 = vpop.f32.mrb[14].mxu0 }
0x119f   : > { %v3551_v23 = vadd.f32 %v4487_v50, %v4113_v22  ;;  %v3545_v2 = vpop.f32.mrb[15].mxu0 }
0x11a0   : > { %v3546_v4 = vadd.f32 %v4113_v22, %v3545_v2 }
0x11a1   : > { %v3555_v0 = vadd.f32 %v4873_v57, %v3551_v23 }
0x11a2   : > { %v3554_v3 = vadd.f32 %v4877_v58, %v3546_v4  ;;  %v3603_v58 = vld [vmem:[%s3602_s20] sm:$0xff] }
0x11a3   : > { %v3563_v1 = vsel %vm72_vm0, %v3555_v0, 0.0  ;;  %v4585_v36 = vpack.c.bf16 %v3604_v32, %v3603_v58 }
0x11a4   : > { %3564 = vadd.xlane.f32.xlu1 %v3563_v1  ;;  %v3560_v24 = vsel %vm72_vm0, %v3554_v3, 0.0 }
0x11a5   : > { %3561 = vadd.xlane.f32.xlu0 %v3560_v24  ;;  %4586 = vmatprep.subr.bf16.mxu1 %v4585_v36 }
0x11a6   : > { %4588 = vmatpush3.bf16.msra.mxu1 %v4585_v36  ;;  %v4122_v36 = vld [vmem:[%s3724_s3] ss:$0 sm:$0xff] }
0x11a7   : > { %4590 = vmatprep.subr.bf16.mxu1 %v4589_v39 }
0x11aa   : > { %4592 = vmatpush3.bf16.msra.mxu1 %v4589_v39 }
0x1231   : > { %v3565_v46 = vpop.xlane.xlu1 %3564 }
0x1232   : > { %v3567_v13 = vmul.f32 0.03125, %v3565_v46  ;;  %v3562_v25 = vpop.xlane.xlu0 %3561 }
0x1233   : > { %v3566_v26 = vmul.f32 0.03125, %v3562_v25 }
0x1234   : > { %v3569_v27 = vsub.f32 %v3555_v0, %v3567_v13 }
0x1235   : > { %v3568_v28 = vsub.f32 %v3554_v3, %v3566_v26 }
0x1236   : > { %v3571_v31 = vmul.f32 %v3569_v27, %v3569_v27 }
0x1237   : > { %v3570_v29 = vmul.f32 %v3568_v28, %v3568_v28 }
0x1238   : > { %v3575_v57 = vsel %vm72_vm0, %v3571_v31, 0.0 }
0x1239   : > { %v3572_v30 = vsel %vm72_vm0, %v3570_v29, 0.0 }
0x123a   : > { %3573 = vadd.xlane.f32.xlu0 %v3572_v30 }
0x123e   : > { %3576 = vadd.xlane.f32.xlu0 %v3575_v57 }
0x12c7   : > { %v3574_v40 = vpop.xlane.xlu0 %3573 }
0x12c8   : > { %v3578_v33 = vmul.f32 0.03125, %v3574_v40 }
0x12ca   : > { %v3580_v41 = vadd.f32 1e-12, %v3578_v33 }
0x12cb   : > { %v3577_v42 = vpop.xlane.xlu0 %3576 }
0x12cc   : > { %4783 = vrsqrt.f32 %v3580_v41  ;;  %v3579_v49 = vmul.f32 0.03125, %v3577_v42 }
0x12ce   : > { %v3581_v43 = vadd.f32 1e-12, %v3579_v49 }
0x12d0   : > { %4785 = vrsqrt.f32 %v3581_v43 }
0x12d6   : > { %v4784_v44 = vpop.eup %4783 }
0x12d7   : > { %v3584_v47 = vmul.f32 %v4784_v44, %v3568_v28 }
0x12d9   : > { %v3592_v59 = vmul.f32 %v4116_v45, %v3584_v47 }
0x12da   : > { %v4786_v60 = vpop.eup %4785 }
0x12db   : > { %v3585_v61 = vmul.f32 %v4786_v60, %v3569_v27  ;;  %v3600_v62 = vadd.f32 %v4117_v56, %v3592_v59 }
0x12dd   : > { %v3593_v48 = vmul.f32 %v4116_v45, %v3585_v61  ;;  %4496 = vmatprep.mubr.msk.f32.mxu1 %vm72_vm0, %v3600_v62 }
0x12df   : > { %v3601_v63 = vadd.f32 %v4117_v56, %v3593_v48 }
0x12e1   : > { %4497 = vmatmul.mubr.msk.f32.vlgmr.msra.gmra.mrb[20].mxu1 %vm72_vm0, %v3601_v63 }
0x13b4   : > { %v4498_v22 = vpop.f32.mrb[20].mxu1 }
0x13b5   : > { %v3693_v50 = vadd.f32 %v4498_v22, %v4118_v12  ;;  %v3687_v23 = vpop.f32.mrb[21].mxu1 }
0x13b6   : > { %v3688_v2 = vadd.f32 %v4118_v12, %v3687_v23 }
0x13b7   : > { %v3699_v4 = vmul.f32 0.044715, %v3693_v50  ;;  %v3697_v58 = vmul.f32 0.5, %v3693_v50 }
0x13b8   : > { %v3698_v0 = vmul.f32 0.044715, %v3688_v2  ;;  %v3696_v31 = vmul.f32 0.5, %v3688_v2 }
0x13b9   : > { %v3701_v3 = vmul.f32 %v3699_v4, %v3693_v50 }
0x13ba   : > { %v3700_v1 = vmul.f32 %v3698_v0, %v3688_v2 }
0x13bb   : > { %v3703_v24 = vmul.f32 %v3701_v3, %v3693_v50 }
0x13bc   : > { %v3702_v46 = vmul.f32 %v3700_v1, %v3688_v2 }
0x13bd   : > { %v3705_v13 = vadd.f32 %v3703_v24, %v3693_v50 }
0x13be   : > { %v3704_v25 = vadd.f32 %v3702_v46, %v3688_v2 }
0x13bf   : > { %v3707_v26 = vmul.f32 0.7978846, %v3705_v13 }
0x13c0   : > { %v3706_v27 = vmul.f32 0.7978846, %v3704_v25 }
0x13c1   : > { %4787 = vtanh.f32 %v3707_v26 }
0x13c2   : > { %4789 = vtanh.f32 %v3706_v27 }
0x13cb   : > { %v4788_v28 = vpop.eup %4787 }
0x13cc   : > { %v4790_v29 = vpop.eup %4789  ;;  %v3711_v30 = vadd.f32 1.0, %v4788_v28 }
0x13cd   : > { %v3710_v57 = vadd.f32 1.0, %v4790_v29 }
0x13ce   : > { %v3713_v35 = vmul.f32 %v3711_v30, %v3697_v58 }
0x13cf   : > { %v3712_v32 = vmul.f32 %v3710_v57, %v3696_v31  ;;  %v3878_v31 = vld [vmem:[%s5650_s16] sm:$0xff] (%p1990_p1) }
0x13d1   : > { %4515 = vmatprep.mubr.msk.f32.mxu0 %vm1858_vm5, %v3712_v32  ;;  %v3879_v32 = vld [vmem:[%s5650_s16 + $0x8] sm:$0xff] (%p1990_p1) }
0x13d2   : > { %4516 = vmatmul.mubr.msk.f32.vlgmr.msra.gmra.mrb[16].mxu0 %vm1858_vm5, %v3713_v35  ;;  %v3880_v35 = vld [vmem:[%s5650_s16 + $0x10] sm:$0xff] (%p1990_p1) }
0x13d3   :  { %4526 = vmatprep.mubr.msk.f32.mxu0 (%p1990_p1), %vm4904_vm7, %v4905_v14 }
0x14a5   : > { %v4517_v38 = vpop.f32.mrb[16].mxu0 }
0x14a6   : > { %v3811_v39 = vadd.f32 %v4517_v38, %v4122_v36  ;;  %v3805_v40 = vpop.f32.mrb[17].mxu0  ;;  %v4610_v38 = vpack.c.bf16 (%p1990_p1), %v3879_v32, %v3878_v31 }
0x14a7   : > { %v3806_v33 = vadd.f32 %v4122_v36, %v3805_v40  ;;  %v4903_v36 = vmov (%p1990_p1), 0.0|0.0  }
0x14a8   : > { %v3815_v41 = vadd.f32 %v3811_v39, %v3601_v63  ;;  %4609 = vmatprep.subr.bf16.mxu0 (%p1990_p1), %v4903_v36 }
0x14a9   : > { %v3814_v42 = vadd.f32 %v3806_v33, %v3600_v62  ;;  %4611 = vmatpush3.bf16.msra.mxu0 (%p1990_p1), %v4610_v38 }
0x14aa   : > { %v3823_v49 = vsel %vm72_vm0, %v3815_v41, 0.0  ;;  %4612 = vmatprep.subr.bf16.mxu0 (%p1990_p1), %v4903_v36 }
0x14ab   : > { %3824 = vadd.xlane.f32.xlu0 %v3823_v49  ;;  %v3820_v43 = vsel %vm72_vm0, %v3814_v42, 0.0 }
0x14ac   : > { %3821 = vadd.xlane.f32.xlu1 %v3820_v43 }
0x1538   : > { %v3825_v44 = vpop.xlane.xlu0 %3824 }
0x1539   : > { %v3827_v45 = vmul.f32 0.03125, %v3825_v44  ;;  %v3822_v47 = vpop.xlane.xlu1 %3821 }
0x153a   : > { %v3826_v56 = vmul.f32 0.03125, %v3822_v47 }
0x153b   : > { %v3829_v59 = vsub.f32 %v3815_v41, %v3827_v45 }
0x153c   : > { %v3828_v60 = vsub.f32 %v3814_v42, %v3826_v56 }
0x153d   : > { %v3831_v61 = vmul.f32 %v3829_v59, %v3829_v59 }
0x153e   : > { %v3830_v48 = vmul.f32 %v3828_v60, %v3828_v60 }
0x153f   : > { %v3835_v51 = vsel %vm72_vm0, %v3831_v61, 0.0 }
0x1540   : > { %3836 = vadd.xlane.f32.xlu0 %v3835_v51  ;;  %v3832_v62 = vsel %vm72_vm0, %v3830_v48, 0.0 }
0x1541   : > { %3833 = vadd.xlane.f32.xlu1 %v3832_v62 }
0x15cd   : > { %v3837_v63 = vpop.xlane.xlu0 %3836 }
0x15ce   : > { %v3839_v53 = vmul.f32 0.03125, %v3837_v63  ;;  %v3834_v52 = vpop.xlane.xlu1 %3833 }
0x15cf   : > { %v3838_v37 = vmul.f32 0.03125, %v3834_v52 }
0x15d0   : > { %v3841_v6 = vadd.f32 1e-12, %v3839_v53 }
0x15d1   : > { %v3840_v7 = vadd.f32 1e-12, %v3838_v37 }
0x15d2   : > { %4791 = vrsqrt.f32 %v3841_v6 }
0x15d3   : > { %4793 = vrsqrt.f32 %v3840_v7 }
0x15dc   : > { %v4792_v8 = vpop.eup %4791 }
0x15dd   : > { %v4794_v10 = vpop.eup %4793  ;;  %v3845_v11 = vmul.f32 %v4792_v8, %v3829_v59 }
0x15de   : > { %v3844_v34 = vmul.f32 %v4794_v10, %v3828_v60 }
0x15df   : > { %v3853_v12 = vmul.f32 %v4125_v9, %v3845_v11 }
0x15e0   : > { %v3852_v22 = vmul.f32 %v4125_v9, %v3844_v34 }
0x15e1   : > { %v3861_v57 = vadd.f32 %v4126_v5, %v3853_v12  }
0x15e2   : > { %v3860_v58 = vadd.f32 %v4126_v5, %v3852_v22  }
0x15e3   : > { %v3869_v50 = vsel %vm72_vm0, %v3861_v57, -inf }
0x15e4   : > { %v3870_v23 = vrot.slane %v3869_v50, 4  ;;  %v3862_v2 = vsel %vm72_vm0, %v3860_v58, -inf  ;;  %v3881_v58 = vld [vmem:[%s5650_s16 + $0x18] sm:$0xff] (%p1990_p1) }
0x15e5   : > { %v3863_v4 = vrot.slane %v3862_v2, 4  ;;  %v4613_v15 = vpack.c.bf16 (%p1990_p1), %v3881_v58, %v3880_v35 }
0x15e6   : > { %v3871_v0 = vmax.f32 %v3869_v50, %v3870_v23 }
0x15e7   : > { %v3864_v3 = vmax.f32 %v3862_v2, %v3863_v4  ;;  %4614 = vmatpush3.bf16.msra.mxu0 (%p1990_p1), %v4613_v15 }
0x15e8   : > { %v3872_v1 = vrot.slane %v3871_v0, 2 }
0x15e9   : > { %v3865_v24 = vrot.slane %v3864_v3, 2 }
0x15ea   : > { %v3873_v46 = vmax.f32 %v3871_v0, %v3872_v1 }
0x15eb   : > { %v3866_v13 = vmax.f32 %v3864_v3, %v3865_v24 }
0x15ec   : > { %v3874_v25 = vrot.slane %v3873_v46, 1 }
0x15ed   : > { %v3867_v26 = vrot.slane %v3866_v13, 1  ;;  %1992 = sbr.rel (!%p1990_p1) target bundleno = 2966 (0xb96), region = 141 }
0x15ee   : > { %v3875_v27 = vmax.f32 %v3873_v46, %v3874_v25 }
0x15ef   : > { %v3868_v28 = vmax.f32 %v3866_v13, %v3867_v26 }
0x15f0   : > { %v3877_v29 = vmax.f32 %v4865_v54, %v3875_v27  }
0x15f1   : > { %v3876_v30 = vmax.f32 %v4869_v55, %v3868_v28  }
0x15f2   : > { %v5662_v54 = vmov %v3877_v29 }
0x15f3   : > { %v5663_v55 = vmov %v3876_v30  ;;  %v3892_v16 = vsel (%p1990_p1), %vm3891_vm8, %v3877_v29, %v3876_v30 }
0x15f4   :  { %4527 = vmatmul.mubr.msk.f32.vlgmr.msra.gmra.mrb[0].mxu0 %vm72_vm0, %v3892_v16 }
0x16c7   :  { %v3961_v18 = vpop.f32.mrb[0].mxu0 }
0x16c8   :  { %v3962_v19 = vadd.f32 %v4127_v17, %v3961_v18  ;;  %v4528_v20 = vpop.f32.mrb[1].mxu0 }
0x16ca   :  { %3966 = vst.msk [vmem:[#allocation2] sm:$0x3] %vm3965_vm9, %v3962_v19 }
0x16cb   :  { %4806 = shalt.err (!%p4803_p6)
}
0x16cc   :  { %s4807_s11 = scalar_lea.hbm %s5652_s18, 32 }
0x16cd   :  { %p4808_p7 = scmp.ne.s32.totalorder %s5652_s18, %s4807_s11  ;;  %p4811_p8 = scmp.lt.u32.totalorder %s4807_s11, %s5652_s18 }
0x16cf   :  { %p4813_p9 = pnand %p4811_p8, %p4808_p7 }
0x16d1   :  { %4816 = shalt.err (!%p4813_p9)
}
0x16d2   :  { %3976 = dma.vmem_to_hbm [thread:$0]  %s3974_s7, 32, %s5652_s18, [#allocation3]  }
0x16d3   :  { %4849 = dma.done.wait [#allocation3], 32  }
0x16d4   :  { %4850 = vsyncadd [#allocation3], 4294967264 }
0x16d5   :  { %3980 = vsyncpa [#allocation3], 1 }

</bundles_post_ra>
